<compile_context>
chip_gen: v7x
topology: tpu7x:2x2x1
jax: 0.10.0
libtpu: 0.0.40
codegen_flags: <defaults>
</compile_context>

<pallas_src>
import functools

import jax
import jax.numpy as jnp
from jax import lax
from jax.experimental import pallas as pl
from jax.experimental.pallas import tpu as pltpu

_SUBLANE = 8


def _round_up(x, m):
    return (x + m - 1) // m * m


def _cdiv(a, b):
    return -(-a // b)


def actor_kernel(x_ref, w1_ref, b1_ref, w2_ref, b2_ref, w3_ref, b3_ref, o_ref):
    x = x_ref[...]
    # fc1 + ReLU  (MXU matmul, ragged K=state_size, f32 accumulate)
    h1 = jnp.dot(x, w1_ref[...], preferred_element_type=jnp.float32,
                 precision=lax.Precision.HIGHEST) + b1_ref[...]
    h1 = jnp.maximum(h1, 0.0)
    # fc2 + ReLU
    h2 = jnp.dot(h1, w2_ref[...], preferred_element_type=jnp.float32,
                 precision=lax.Precision.HIGHEST) + b2_ref[...]
    h2 = jnp.maximum(h2, 0.0)
    # fc3 + tanh  (narrow N=action_size output; masked vst cost is negligible
    # and output HBM writeback shrinks 32x vs. a 128-padded block)
    out = jnp.dot(h2, w3_ref[...], preferred_element_type=jnp.float32,
                  precision=lax.Precision.HIGHEST) + b3_ref[...]
    o_ref[...] = jnp.tanh(out).astype(o_ref.dtype)


def _choose_batch_tile(B, batch_tile):
    """Pick a batch tile: <= batch_tile, multiple of 8; if more than one grid
    step is needed, prefer an even step count so v7x's two TensorCores split
    the 'parallel' grid evenly (no effect on v5e/v6e)."""
    Bt = min(batch_tile, _round_up(B, _SUBLANE))
    n = _cdiv(B, Bt)
    if n > 1 and n % 2 == 1:
        Bt = _round_up(_cdiv(B, n + 1), _SUBLANE)
        n = _cdiv(B, Bt)
    return Bt, n


@functools.partial(jax.jit, static_argnames=("batch_tile",))
def actor_forward(state, params, *, batch_tile=1024):
    """state: [B, state_size] f32 -> actions: [B, action_size] f32."""
    w1, b1, w2, b2, w3, b3 = params
    B, S = state.shape
    H1 = w1.shape[1]
    H2 = w2.shape[1]
    A = w3.shape[1]

    Bt, n_steps = _choose_batch_tile(B, batch_tile)

    # Weights/biases: same block for every grid step -> stay VMEM-resident
    # while batch tiles stream through the pipeline.
    const_spec = lambda shape: pl.BlockSpec(shape, lambda i: (0, 0))

    return pl.pallas_call(
        actor_kernel,
        out_shape=jax.ShapeDtypeStruct((B, A), jnp.float32),
        grid_spec=pltpu.PrefetchScalarGridSpec(
            num_scalar_prefetch=0,
            grid=(n_steps,),
            in_specs=[
                pl.BlockSpec((Bt, S), lambda i: (i, 0)),   # state tile (ragged K ok)
                const_spec((S, H1)),                       # w1
                const_spec((1, H1)),                       # b1
                const_spec((H1, H2)),                      # w2
                const_spec((1, H2)),                       # b2
                const_spec((H2, A)),                       # w3
                const_spec((1, A)),                        # b3
            ],
            out_specs=pl.BlockSpec((Bt, A), lambda i: (i, 0)),
        ),
        compiler_params=pltpu.CompilerParams(
            dimension_semantics=("parallel",),             # v7x: 2 TCs share batch
        ),
    )(state, w1, b1, w2, b2, w3, b3)


def init_actor_params(key, state_size, action_size, hidden1=256, hidden2=128):
    """Deterministic init mirroring the PyTorch module's reset_parameters():
    fc1/fc2 weights ~ U(-1/sqrt(fan_in), 1/sqrt(fan_in)); fc3 weights ~ U(-3e-3, 3e-3);
    biases use nn.Linear's default uniform init. Weights stored as [in, out]
    (= PyTorch weight.T). No padding needed: params are used as-is by the kernel."""
    ks = jax.random.split(key, 6)

    def uni(k, shape, lim):
        return jax.random.uniform(k, shape, jnp.float32, minval=-lim, maxval=lim)

    lim1 = 1.0 / jnp.sqrt(jnp.float32(state_size))
    lim2 = 1.0 / jnp.sqrt(jnp.float32(hidden1))
    lim3 = 1.0 / jnp.sqrt(jnp.float32(hidden2))

    w1 = uni(ks[0], (state_size, hidden1), lim1)
    b1 = uni(ks[1], (1, hidden1), lim1)
    w2 = uni(ks[2], (hidden1, hidden2), lim2)
    b2 = uni(ks[3], (1, hidden2), lim2)
    w3 = uni(ks[4], (hidden2, action_size), 0.003)
    b3 = uni(ks[5], (1, action_size), lim3)
    return (w1, b1, w2, b2, w3, b3)


def actor_reference(state, params):
    """Pure-JAX reference for correctness checking (f32-exact matmuls)."""
    w1, b1, w2, b2, w3, b3 = params
    hp = lax.Precision.HIGHEST
    h = jax.nn.relu(jnp.dot(state, w1, precision=hp) + b1)
    h = jax.nn.relu(jnp.dot(h, w2, precision=hp) + b2)
    return jnp.tanh(jnp.dot(h, w3, precision=hp) + b3)


if __name__ == "__main__":
    key = jax.random.PRNGKey(0)
    k_params, k_state, k_state_big = jax.random.split(key, 3)

    state_size = 33      # e.g. Reacher observation dim
    action_size = 4
    hidden1, hidden2 = 256, 128

    params = init_actor_params(k_params, state_size, action_size, hidden1, hidden2)

    # Small batch: single grid step, 8-row tile (action-selection path).
    batch = 8
    state = jax.random.normal(k_state, (batch, state_size), dtype=jnp.float32)
    out = jax.block_until_ready(actor_forward(state, params))
    ref = actor_reference(state, params)
    assert out.shape == (batch, action_size)
    assert jnp.allclose(out, ref, atol=1e-5, rtol=1e-5)

    # Larger, non-multiple batch: default tile gives one (partial) block;
    # batch_tile=256 exercises the multi-step grid + v7x even-split path
    # (Bt=152, grid=4, partial last block).
    batch_big = 600
    state_big = jax.random.normal(k_state_big, (batch_big, state_size), dtype=jnp.float32)
    out_big = jax.block_until_ready(actor_forward(state_big, params))
    ref_big = actor_reference(state_big, params)
    assert out_big.shape == (batch_big, action_size)
    assert jnp.allclose(out_big, ref_big, atol=1e-5, rtol=1e-5)

    out_tiled = jax.block_until_ready(actor_forward(state_big, params, batch_tile=256))
    assert out_tiled.shape == (batch_big, action_size)
    assert jnp.allclose(out_tiled, ref_big, atol=1e-5, rtol=1e-5)

    print("KERNEL_OK")
</pallas_src>

<mosaic_0001>
module attributes {stable_mosaic.version = 11 : i64} {
  func.func @actor_kernel(%arg0: i32, %arg1: memref<8x33xf32, #tpu.memory_space<vmem>>, %arg2: memref<33x256xf32, #tpu.memory_space<vmem>>, %arg3: memref<1x256xf32, #tpu.memory_space<vmem>>, %arg4: memref<256x128xf32, #tpu.memory_space<vmem>>, %arg5: memref<1x128xf32, #tpu.memory_space<vmem>>, %arg6: memref<128x4xf32, #tpu.memory_space<vmem>>, %arg7: memref<1x4xf32, #tpu.memory_space<vmem>>, %arg8: memref<8x4xf32, #tpu.memory_space<vmem>>) attributes {dimension_semantics = [#tpu.dimension_semantics<parallel>], iteration_bounds = array<i64: 1>, scalar_prefetch = 0 : i64, scratch_operands = 0 : i64, tpu.core_type = #tpu.core_type<tc>, window_params = [{transform_indices = @transform_0, window_bounds = array<i64: 8, 33>}, {pipeline_mode = #tpu.pipeline_mode<synchronous>, transform_indices = @transform_1, window_bounds = array<i64: 33, 256>}, {pipeline_mode = #tpu.pipeline_mode<synchronous>, transform_indices = @transform_2, window_bounds = array<i64: 1, 256>}, {pipeline_mode = #tpu.pipeline_mode<synchronous>, transform_indices = @transform_3, window_bounds = array<i64: 256, 128>}, {pipeline_mode = #tpu.pipeline_mode<synchronous>, transform_indices = @transform_4, window_bounds = array<i64: 1, 128>}, {pipeline_mode = #tpu.pipeline_mode<synchronous>, transform_indices = @transform_5, window_bounds = array<i64: 128, 4>}, {pipeline_mode = #tpu.pipeline_mode<synchronous>, transform_indices = @transform_6, window_bounds = array<i64: 1, 4>}, {transform_indices = @transform_7, window_bounds = array<i64: 8, 4>}]} {
    %c0 = arith.constant 0 : index
    %c0_0 = arith.constant 0 : index
    %0 = vector.load %arg1[%c0, %c0_0] : memref<8x33xf32, #tpu.memory_space<vmem>>, vector<8x33xf32>
    %c0_1 = arith.constant 0 : index
    %c0_2 = arith.constant 0 : index
    %1 = vector.load %arg2[%c0_1, %c0_2] : memref<33x256xf32, #tpu.memory_space<vmem>>, vector<33x256xf32>
    %cst = arith.constant dense<0.000000e+00> : vector<8x256xf32>
    %2 = tpu.matmul %0, %1, %cst {dimension_numbers = #tpu.dot_dimension_numbers<[1], [0], [0], [1], [0, 0, 1, 1], [], []>, precision = #tpu.contract_precision<fp32>} : vector<8x33xf32>, vector<33x256xf32>, vector<8x256xf32> -> vector<8x256xf32>
    %c0_3 = arith.constant 0 : index
    %c0_4 = arith.constant 0 : index
    %3 = vector.load %arg3[%c0_3, %c0_4] : memref<1x256xf32, #tpu.memory_space<vmem>>, vector<1x256xf32>
    %4 = vector.broadcast %3 : vector<1x256xf32> to vector<8x256xf32>
    %5 = arith.addf %2, %4 : vector<8x256xf32>
    %cst_5 = arith.constant 0.000000e+00 : f32
    %6 = vector.broadcast %cst_5 : f32 to vector<8x256xf32>
    %7 = arith.maximumf %5, %6 : vector<8x256xf32>
    %c0_6 = arith.constant 0 : index
    %c0_7 = arith.constant 0 : index
    %8 = vector.load %arg4[%c0_6, %c0_7] : memref<256x128xf32, #tpu.memory_space<vmem>>, vector<256x128xf32>
    %cst_8 = arith.constant dense<0.000000e+00> : vector<8x128xf32>
    %9 = tpu.matmul %7, %8, %cst_8 {dimension_numbers = #tpu.dot_dimension_numbers<[1], [0], [0], [1], [0, 0, 1, 1], [], []>, precision = #tpu.contract_precision<fp32>} : vector<8x256xf32>, vector<256x128xf32>, vector<8x128xf32> -> vector<8x128xf32>
    %c0_9 = arith.constant 0 : index
    %c0_10 = arith.constant 0 : index
    %10 = vector.load %arg5[%c0_9, %c0_10] : memref<1x128xf32, #tpu.memory_space<vmem>>, vector<1x128xf32>
    %11 = vector.broadcast %10 : vector<1x128xf32> to vector<8x128xf32>
    %12 = arith.addf %9, %11 : vector<8x128xf32>
    %cst_11 = arith.constant 0.000000e+00 : f32
    %13 = vector.broadcast %cst_11 : f32 to vector<8x128xf32>
    %14 = arith.maximumf %12, %13 : vector<8x128xf32>
    %c0_12 = arith.constant 0 : index
    %c0_13 = arith.constant 0 : index
    %15 = vector.load %arg6[%c0_12, %c0_13] : memref<128x4xf32, #tpu.memory_space<vmem>>, vector<128x4xf32>
    %cst_14 = arith.constant dense<0.000000e+00> : vector<8x4xf32>
    %16 = tpu.matmul %14, %15, %cst_14 {dimension_numbers = #tpu.dot_dimension_numbers<[1], [0], [0], [1], [0, 0, 1, 1], [], []>, precision = #tpu.contract_precision<fp32>} : vector<8x128xf32>, vector<128x4xf32>, vector<8x4xf32> -> vector<8x4xf32>
    %c0_15 = arith.constant 0 : index
    %c0_16 = arith.constant 0 : index
    %17 = vector.load %arg7[%c0_15, %c0_16] : memref<1x4xf32, #tpu.memory_space<vmem>>, vector<1x4xf32>
    %18 = vector.broadcast %17 : vector<1x4xf32> to vector<8x4xf32>
    %19 = arith.addf %16, %18 : vector<8x4xf32>
    %20 = math.tanh %19 : vector<8x4xf32>
    %c0_17 = arith.constant 0 : index
    %c0_18 = arith.constant 0 : index
    %21 = vector.load %arg8[%c0_17, %c0_18] : memref<8x4xf32, #tpu.memory_space<vmem>>, vector<8x4xf32>
    tpu.vector_store %arg8[%c0_17, %c0_18], %20 {strides = array<i32>} : memref<8x4xf32, #tpu.memory_space<vmem>>, vector<8x4xf32>,
    return
  }
  func.func @transform_0(%arg0: i32) -> (i32, i32) {
    %c0_i32 = arith.constant 0 : i32
    %c0_i32_0 = arith.constant 0 : i32
    return %arg0, %c0_i32 : i32, i32
  }
  func.func @transform_1(%arg0: i32) -> (i32, i32) {
    %c0_i32 = arith.constant 0 : i32
    %c0_i32_0 = arith.constant 0 : i32
    %c0_i32_1 = arith.constant 0 : i32
    return %c0_i32, %c0_i32_0 : i32, i32
  }
  func.func @transform_2(%arg0: i32) -> (i32, i32) {
    %c0_i32 = arith.constant 0 : i32
    %c0_i32_0 = arith.constant 0 : i32
    %c0_i32_1 = arith.constant 0 : i32
    return %c0_i32, %c0_i32_0 : i32, i32
  }
  func.func @transform_3(%arg0: i32) -> (i32, i32) {
    %c0_i32 = arith.constant 0 : i32
    %c0_i32_0 = arith.constant 0 : i32
    %c0_i32_1 = arith.constant 0 : i32
    return %c0_i32, %c0_i32_0 : i32, i32
  }
  func.func @transform_4(%arg0: i32) -> (i32, i32) {
    %c0_i32 = arith.constant 0 : i32
    %c0_i32_0 = arith.constant 0 : i32
    %c0_i32_1 = arith.constant 0 : i32
    return %c0_i32, %c0_i32_0 : i32, i32
  }
  func.func @transform_5(%arg0: i32) -> (i32, i32) {
    %c0_i32 = arith.constant 0 : i32
    %c0_i32_0 = arith.constant 0 : i32
    %c0_i32_1 = arith.constant 0 : i32
    return %c0_i32, %c0_i32_0 : i32, i32
  }
  func.func @transform_6(%arg0: i32) -> (i32, i32) {
    %c0_i32 = arith.constant 0 : i32
    %c0_i32_0 = arith.constant 0 : i32
    %c0_i32_1 = arith.constant 0 : i32
    return %c0_i32, %c0_i32_0 : i32, i32
  }
  func.func @transform_7(%arg0: i32) -> (i32, i32) {
    %c0_i32 = arith.constant 0 : i32
    %c0_i32_0 = arith.constant 0 : i32
    return %arg0, %c0_i32 : i32, i32
  }
}

</mosaic_0001>

<bundles_post_ra>
// kernel: actor_forward.1
= control target key start
LH: loop header
LB: loop body
LE: loop exit
PB: predicated region body
PF: predicated region fallthrough
CT: control target
= control target key end

     0   :  { %12 = vsyncpa [#allocation3], 0  ;;  %s3181_s24 = smov [#allocation2]   ;;  %s4195_s0 = inlined_call_operand.vmem [shape: f32[8,33], index: 0, kind: input, shape index: {}]   ;;  %s4196_s1 = inlined_call_operand.vmem [shape: f32[33,256], index: 1, kind: input, shape index: {}]   ;;  %s4197_s2 = inlined_call_operand.vmem [shape: f32[1,256], index: 2, kind: input, shape index: {}]   ;;  %s4198_s3 = inlined_call_operand.hbm [shape: f32[256,128], index: 3, kind: input, shape index: {}]   ;;  %s4199_s4 = inlined_call_operand.vmem [shape: f32[1,128], index: 4, kind: input, shape index: {}]   ;;  %s4200_s5 = inlined_call_operand.vmem [shape: f32[128,4], index: 5, kind: input, shape index: {}]   ;;  %s4201_s6 = inlined_call_operand.vmem [shape: f32[1,4], index: 6, kind: input, shape index: {}]   ;;  %s4202_s7 = inlined_call_operand.vmem [shape: f32[8,4], index: 7, kind: output, shape index: {}]  }
   0x1   :  { %s24_s25 = sshll.u32 %s3181_s24, 4  ;;  %s3157_s28 = scalar_lea.hbm %s4198_s3, 4096  ;;  %s25_s25 = int_to_ptr.vmem [resolvable:$true] %s24_s25 }
   0x2   :  { %p3158_p0 = scmp.ne.s32.totalorder %s4198_s3, %s3157_s28  ;;  %p3161_p1 = scmp.lt.u32.totalorder %s3157_s28, %s4198_s3 }
   0x4   :  { %p3163_p2 = pnand %p3161_p1, %p3158_p0 }
   0x6   :  { %3166 = shalt.err (!%p3163_p2)
}
   0x7   :  { %s3167_s10 = scalar_lea.vmem %s25_s25, 4096  ;;  %p3172_p4 = scmp.lt.s32.totalorder %s25_s25, %s25_s25 }
   0x8   :  { %p3168_p3 = scmp.ne.s32.totalorder %s25_s25, %s3167_s10  ;;  %p3173_p5 = scmp.lt.s32.totalorder %s3167_s10, %s3167_s10 }
   0xa   :  { %p3174_p6 = por %p3173_p5, %p3172_p4 }
   0xc   :  { %p3175_p7 = pnand %p3174_p6, %p3168_p3 }
   0xe   :  { %3178 = shalt.err (!%p3175_p7)
}
   0xf   :  { %s3182_s11 = smov 128   ;;  %s3183_s12 = smov 8  }
  0x10   :  { %30 = dma.hbm_to_vmem [thread:$0]  %s4198_s3, 4096, %s25_s25, [#allocation3], %s3182_s11, %s3182_s11, %s3183_s12  }
  0x11   :  { %3179 = dma.done.wait [#allocation3], 4096  }
  0x12   :  { %3180 = vsyncadd [#allocation3], 4294963200  ;;  %v4209_v0 = vmov 0.0   ;;  %v42_v1 = vld [vmem:[%s4196_s1 + $0x8] sm:$0xff]  ;;  %v44_v2 = vld [vmem:[%s4196_s1 + $0x18] sm:$0xff]  ;;  %vm67_vm0 = vcmask 1040384  }
  0x13   :  { %148 = vmatprep.mubr.f32.mxu0 %v4209_v0  ;;  %v41_v3 = vld [vmem:[%s4196_s1] sm:$0xff]  ;;  %v74_v4 = vand.u32 4294901760, %v42_v1  ;;  %v78_v5 = vand.u32 4294901760, %v44_v2  ;;  %v43_v6 = vld [vmem:[%s4196_s1 + $0x10] sm:$0xff]  ;;  %v46_v8 = vld [vmem:[%s4196_s1 + $0x28] sm:$0xff]  ;;  %vm63_vm1 = vcmask 269312  }
  0x14   :  { %v76_v7 = vand.u32 4294901760, %v41_v3  ;;  %v48_v9 = vld [vmem:[%s4196_s1 + $0x38] sm:$0xff]  ;;  %v80_v10 = vand.u32 4294901760, %v43_v6  ;;  %v82_v11 = vand.u32 4294901760, %v46_v8  ;;  %v45_v13 = vld [vmem:[%s4196_s1 + $0x20] sm:$0xff]  ;;  %v47_v14 = vld [vmem:[%s4196_s1 + $0x30] sm:$0xff] }
  0x15   :  { %v86_v12 = vand.u32 4294901760, %v48_v9  ;;  %v3264_v15 = vpack.c.bf16 %v78_v5, %v74_v4  ;;  %v3266_v16 = vsub.f32 %v42_v1, %v74_v4  ;;  %v3268_v17 = vsub.f32 %v44_v2, %v78_v5  ;;  %v50_v19 = vld [vmem:[%s4196_s1 + $0x48] sm:$0x1]  ;;  %v49_v20 = vld [vmem:[%s4196_s1 + $0x40] sm:$0x1] }
  0x16   :  { %v3270_v18 = vsub.f32 %v41_v3, %v76_v7  ;;  %v3278_v21 = vpack.c.bf16 %v80_v10, %v76_v7  ;;  %v3280_v22 = vsub.f32 %v43_v6, %v80_v10  ;;  %v3284_v24 = vsub.f32 %v46_v8, %v82_v11  ;;  %v40_v29 = vld [vmem:[%s4195_s0] sm:$0xff] }
  0x17   :  { %v3282_v23 = vpack.c.bf16 %v86_v12, %v82_v11  ;;  %2744 = vmatprep.subr.bf16.mxu0 %v3264_v15  ;;  %v3287_v25 = vsub.f32 %v48_v9, %v86_v12  ;;  %v84_v26 = vand.u32 4294901760, %v45_v13  ;;  %v88_v27 = vand.u32 4294901760, %v47_v14  ;;  %v661_v9 = vld [vmem:[#allocation2 + $0x80] sm:$0xff]  ;;  %v662_v12 = vld [vmem:[#allocation2 + $0x88] sm:$0xff] }
  0x18   :  { %v72_v28 = vsel %vm67_vm0, %v50_v19, 0  ;;  %2746 = vmatpush1.bf16.msra.mxu0 %v3278_v21  ;;  %v69_v31 = vsel %vm67_vm0, %v49_v20, 0  ;;  %v162_v32 = vand.u32 4294901760, %v3266_v16  ;;  %v174_v33 = vand.u32 4294901760, %v3268_v17  ;;  %v663_v20 = vld [vmem:[#allocation2 + $0x90] sm:$0xff] }
  0x19   :  { %v3294_v30 = vand.u32 4294901760, %v72_v28  ;;  %2748 = vmatprep.subr.bf16.mxu0 %v3282_v23  ;;  %v3300_v34 = vpack.c.bf16 %v88_v27, %v84_v26  ;;  %v3302_v35 = vsub.f32 %v45_v13, %v84_v26  ;;  %v3304_v36 = vsub.f32 %v47_v14, %v88_v27  ;;  %v645_v13 = vld [vmem:[#allocation2] sm:$0xff]  ;;  %v646_v14 = vld [vmem:[#allocation2 + $0x8] sm:$0xff]  ;;  %v664_v26 = vld [vmem:[#allocation2 + $0x98] sm:$0xff] }
  0x1a   :  { %v3306_v37 = vand.u32 4294901760, %v69_v31  ;;  %v163_v38 = vsub.f32 %v3266_v16, %v162_v32  ;;  %v175_v39 = vsub.f32 %v3268_v17, %v174_v33  ;;  %v65_v40 = vsel %vm63_vm1, %v40_v29, 0  ;;  %v647_v27 = vld [vmem:[#allocation2 + $0x10] sm:$0xff] }
  0x1b   :  { %v168_v41 = vand.u32 4294901760, %v3270_v18  ;;  %v3319_v43 = vand.u32 4294901760, %v65_v40  ;;  %v180_v44 = vand.u32 4294901760, %v3280_v22  ;;  %v186_v45 = vand.u32 4294901760, %v3284_v24 }
  0x1c   :  { %v3317_v42 = vsub.f32 %v69_v31, %v3306_v37  ;;  %2750 = vmatpush1.bf16.msra.mxu0 %v3300_v34  ;;  %v164_v46 = vand.u32 4294901760, %v163_v38  ;;  %v176_v47 = vand.u32 4294901760, %v175_v39  ;;  %v4208_v49 = vand.u32 4294901760, %v3287_v25 }
  0x1d   :  { %v169_v48 = vsub.f32 %v3270_v18, %v168_v41  ;;  %91 = vmatprep.subr.mxu0 %v3294_v30  ;;  %v3330_v50 = vsub.f32 %v65_v40, %v3319_v43  ;;  %v181_v51 = vsub.f32 %v3280_v22, %v180_v44  ;;  %v187_v52 = vsub.f32 %v3284_v24, %v186_v45 }
  0x1e   :  { %v4206_v53 = vand.u32 4294901760, %v3302_v35  ;;  %v2751_v54 = vpack.c.bf16 %v176_v47, %v164_v46  ;;  %v199_v56 = vsub.f32 %v3287_v25, %v4208_v49  ;;  %v4205_v57 = vand.u32 4294901760, %v3304_v36 }
  0x1f   :  { %v170_v55 = vand.u32 4294901760, %v169_v48  ;;  %v4207_v58 = vand.u32 4294901760, %v3330_v50  ;;  %v182_v59 = vand.u32 4294901760, %v181_v51  ;;  %v188_v60 = vand.u32 4294901760, %v187_v52 }
  0x20   :  { %v193_v61 = vsub.f32 %v3302_v35, %v4206_v53  ;;  %93 = vmatpush1.msra.mxu0 %v3306_v37  ;;  %v200_v62 = vand.u32 4294901760, %v199_v56  ;;  %v205_v63 = vsub.f32 %v3304_v36, %v4205_v57  ;;  %v3352_v1 = vsub.f32 %v72_v28, %v3294_v30  ;;  %v665_v56 = vld [vmem:[#allocation2 + $0xa0] sm:$0xff] }
  0x21   :  { %v4203_v2 = vand.u32 4294901760, %v3317_v42  ;;  %2752 = vmatprep.subr.bf16.mxu0 %v2751_v54  ;;  %v152_v3 = vsub.f32 %v3330_v50, %v4207_v58  ;;  %v2753_v5 = vpack.c.bf16 %v182_v59, %v170_v55  ;;  %v2759_v31 = vpack.c.bf16 %v3268_v17, %v3266_v16  ;;  %v648_v54 = vld [vmem:[#allocation2 + $0x18] sm:$0xff]  ;;  %v666_v59 = vld [vmem:[#allocation2 + $0xa8] sm:$0xff] }
  0x22   :  { %v194_v4 = vand.u32 4294901760, %v193_v61  ;;  %v206_v6 = vand.u32 4294901760, %v205_v63  ;;  %v4204_v7 = vand.u32 4294901760, %v3352_v1  ;;  %v2755_v11 = vpack.c.bf16 %v200_v62, %v188_v60 }
  0x23   :  { %v3362_v8 = vsub.f32 %v3317_v42, %v4203_v2  ;;  %v153_v10 = vand.u32 4294901760, %v152_v3  ;;  %v733_v38 = vand.u32 4294901760, %v661_v9  ;;  %v736_v40 = vand.u32 4294901760, %v662_v12  ;;  %v649_v3 = vld [vmem:[#allocation2 + $0x20] sm:$0xff] }
  0x24   :  { %v211_v19 = vsub.f32 %v3352_v1, %v4204_v7  ;;  %v2757_v28 = vpack.c.bf16 %v206_v6, %v194_v4  ;;  %v685_v46 = vand.u32 4294901760, %v645_v13  ;;  %v688_v47 = vand.u32 4294901760, %v646_v14  ;;  %v650_v4 = vld [vmem:[#allocation2 + $0x28] sm:$0xff] }
  0x25   :  { %154 = vmatmul.mubr.f32.vlgmr.msra.gmra.mrb[0].mxu0 %v153_v10  ;;  %v218_v29 = vand.u32 4294901760, %v3362_v8  ;;  %v3371_v48 = vsub.f32 %v661_v9, %v733_v38  ;;  %v739_v51 = vand.u32 4294901760, %v663_v20  ;;  %v742_v52 = vand.u32 4294901760, %v664_v26  ;;  %v667_v10 = vld [vmem:[#allocation2 + $0xb0] sm:$0xff] }
  0x26   :  { %2754 = vmatpush1.bf16.msra.mxu0 %v2753_v5  ;;  %v212_v39 = vand.u32 4294901760, %v211_v19  ;;  %274 = vmatprep.mubr.f32.mxu0 %v4209_v0  ;;  %v691_v55 = vand.u32 4294901760, %v647_v27  ;;  %v3373_v60 = vpack.c.bf16 %v736_v40, %v733_v38  ;;  %v3375_v61 = vsub.f32 %v662_v12, %v736_v40 }
  0x27   :  { %2756 = vmatprep.subr.bf16.mxu0 %v2755_v11  ;;  %v3377_v62 = vpack.c.bf16 %v688_v47, %v685_v46  ;;  %v3379_v63 = vsub.f32 %v645_v13, %v685_v46  ;;  %v3381_v5 = vsub.f32 %v646_v14, %v688_v47  ;;  %v3383_v6 = vpack.c.bf16 %v742_v52, %v739_v51  ;;  %v668_v11 = vld [vmem:[#allocation2 + $0xb8] sm:$0xff]  ;;  %v651_v46 = vld [vmem:[#allocation2 + $0x30] sm:$0xff] }
  0x28   :  { %v3385_v8 = vsub.f32 %v663_v20, %v739_v51  ;;  %v3387_v9 = vsub.f32 %v664_v26, %v742_v52  ;;  %2792 = vmatprep.subr.bf16.mxu1 %v3373_v60  ;;  %v694_v12 = vand.u32 4294901760, %v648_v54  ;;  %v3390_v19 = vsub.f32 %v647_v27, %v691_v55 }
  0x29   :  { %v745_v13 = vand.u32 4294901760, %v665_v56  ;;  %v748_v38 = vand.u32 4294901760, %v666_v59  ;;  %v2761_v14 = vpack.c.bf16 %v3280_v22, %v3270_v18  ;;  %v2763_v20 = vpack.c.bf16 %v3287_v25, %v3284_v24  ;;  %2794 = vmatpush3.bf16.msra.mxu1 %v3377_v62 }
  0x2a   :  { %2758 = vmatpush1.bf16.msra.mxu0 %v2757_v28  ;;  %v697_v26 = vand.u32 4294901760, %v649_v3  ;;  %v700_v40 = vand.u32 4294901760, %v650_v4  ;;  %2796 = vmatprep.subr.bf16.mxu1 %v3383_v6  ;;  %v3398_v28 = vsub.f32 %v648_v54, %v694_v12  ;;  %v751_v47 = vand.u32 4294901760, %v667_v10 }
  0x2b   :  { %213 = vmatprep.subr.mxu0 %v212_v39  ;;  %v3400_v27 = vsub.f32 %v665_v56, %v745_v13  ;;  %v754_v51 = vand.u32 4294901760, %v668_v11  ;;  %v652_v39 = vld [vmem:[#allocation2 + $0x38] sm:$0xff]  ;;  %v3402_v52 = vpack.c.bf16 %v694_v12, %v691_v55  ;;  %v3404_v2 = vsub.f32 %v666_v59, %v748_v38 }
  0x2c   :  { %v3406_v7 = vsub.f32 %v649_v3, %v697_v26  ;;  %v3408_v57 = vsub.f32 %v650_v4, %v700_v40  ;;  %v3410_v53 = vpack.c.bf16 %v748_v38, %v745_v13  ;;  %v3412_v58 = vsub.f32 %v667_v10, %v751_v47 }
  0x2d   :  { %4293 = vst [vmem:[#allocation5_spill] sm:$0xff] %v3402_v52  ;;  %v3414_v54 = vsub.f32 %v668_v11, %v754_v51  ;;  %v703_v56 = vand.u32 4294901760, %v651_v46  ;;  %v706_v49 = vand.u32 4294901760, %v652_v39  ;;  %v2765_v55 = vpack.c.bf16 %v3304_v36, %v3302_v35  ;;  %2798 = vmatpush3.bf16.msra.mxu1 %v3402_v52 }
  0x2e   :  { %219 = vmatpush1.msra.mxu0 %v218_v29  ;;  %4294 = vst [vmem:[#allocation6_spill] sm:$0xff] %v3410_v53  ;;  %v3423_v29 = vpack.c.bf16 %v700_v40, %v697_v26  ;;  %2800 = vmatprep.subr.bf16.mxu1 %v3410_v53  ;;  %v2777_v10 = vpack.c.bf16 %v180_v44, %v168_v41  ;;  %v4301_v11 = vand.u32 4294901760, %v3287_v25  ;;  %v4302_v13 = vand.u32 4294901760, %v3330_v50  ;;  %v669_v25 = vld [vmem:[#allocation2 + $0xc0] sm:$0xff]  ;;  %v674_v26 = vld [vmem:[#allocation2 + $0xe8] sm:$0xff] }
  0x2f   :  { %4295 = vst [vmem:[#allocation7_spill] sm:$0xff] %v3414_v54  ;;  %2760 = vmatprep.subr.bf16.mxu0 %v2759_v31  ;;  %276 = vmatmul.mubr.f32.vlgmr.msra.gmra.mrb[0].mxu0 %v3319_v43  ;;  %v3420_v59 = vsub.f32 %v651_v46, %v703_v56  ;;  %v3425_v3 = vsub.f32 %v652_v39, %v706_v49  ;;  %v4303_v16 = vand.u32 4294901760, %v3302_v35  ;;  %v4304_v17 = vand.u32 4294901760, %v3304_v36  ;;  %v653_v35 = vld [vmem:[#allocation2 + $0x40] sm:$0xff]  ;;  %v654_v36 = vld [vmem:[#allocation2 + $0x48] sm:$0xff] }
  0x30   :  { %2762 = vmatpush1.bf16.msra.mxu0 %v2761_v14  ;;  %366 = vmatprep.mubr.f32.mxu0 %v4209_v0  ;;  %4297 = vst [vmem:[#allocation9_spill] sm:$0xff] %v3423_v29  ;;  %v3428_v31 = vpack.c.bf16 %v754_v51, %v751_v47  ;;  %v3433_v4 = vpack.c.bf16 %v706_v49, %v703_v56  ;;  %v4305_v22 = vand.u32 4294901760, %v3352_v1  ;;  %v4306_v24 = vand.u32 4294901760, %v3317_v42  ;;  %v657_v47 = vld [vmem:[#allocation2 + $0x60] sm:$0xff]  ;;  %v658_v51 = vld [vmem:[#allocation2 + $0x68] sm:$0xff] }
  0x31   :  { %4296 = vst [vmem:[#allocation8_spill] sm:$0xff] %v3420_v59  ;;  %2764 = vmatprep.subr.bf16.mxu0 %v2763_v20  ;;  %4298 = vst [vmem:[#allocation10_spill] sm:$0xff] %v3425_v3  ;;  %2802 = vmatpush3.bf16.msra.mxu1 %v3423_v29  ;;  %v2775_v49 = vpack.c.bf16 %v174_v33, %v162_v32  ;;  %v2779_v12 = vpack.c.bf16 %v4301_v11, %v186_v45  ;;  %v670_v32 = vld [vmem:[#allocation2 + $0xc8] sm:$0xff]  ;;  %v757_v33 = vand.u32 4294901760, %v669_v25  ;;  %v655_v45 = vld [vmem:[#allocation2 + $0x50] sm:$0xff]  ;;  %vm3186_vm2 = vmmov 0  }
  0x32   :  { %4299 = vst [vmem:[#allocation11_spill] sm:$0xff] %v3428_v31  ;;  %2804 = vmatprep.subr.bf16.mxu1 %v3428_v31  ;;  %4300 = vst [vmem:[#allocation12_spill] sm:$0xff] %v3433_v4  ;;  %v2781_v18 = vpack.c.bf16 %v4304_v17, %v4303_v16  ;;  %v709_v41 = vand.u32 4294901760, %v653_v35  ;;  %v673_v20 = vld [vmem:[#allocation2 + $0xe0] sm:$0xff]  ;;  %v772_v46 = vand.u32 4294901760, %v674_v26  ;;  %v721_v39 = vand.u32 4294901760, %v657_v47 }
  0x33   :  { %v769_v40 = vand.u32 4294901760, %v673_v20  ;;  %v724_v56 = vand.u32 4294901760, %v658_v51  ;;  %vm2212_vm3 = vcmask 31744  }
  0x34   :  { %2766 = vmatpush1.bf16.msra.mxu0 %v2765_v55  ;;  %v3497_v16 = vsub.f32 %v653_v35, %v709_v41  ;;  %v3515_v35 = vsub.f32 %v657_v47, %v721_v39 }
  0x35   :  { %308 = vmatprep.subr.mxu0 %v3352_v1  ;;  %2806 = vmatpush3.bf16.msra.mxu1 %v3433_v4  ;;  %v3489_v55 = vpack.c.bf16 %v772_v46, %v769_v40  ;;  %v3495_v11 = vpack.c.bf16 %v724_v56, %v721_v39  ;;  %v4213_v39 = vand.u32 4294901760, %v3381_v5 }
  0x36   :  { %4315 = vst [vmem:[#allocation21_spill] sm:$0xff] %v3497_v16  ;;  %4323 = vst [vmem:[#allocation29_spill] sm:$0xff] %v3515_v35 }
  0x37   :  { %4311 = vst [vmem:[#allocation17_spill] sm:$0xff] %v3489_v55  ;;  %4314 = vst [vmem:[#allocation20_spill] sm:$0xff] %v3495_v11 }
  0x38   :  { %311 = vmatpush1.msra.mxu0 %v3317_v42 }
  0x39   :  { %2768 = vmatprep.subr.bf16.mxu0 %v3264_v15  ;;  %369 = vmatmul.mubr.f32.vlgmr.msra.gmra.mrb[0].mxu0 %v3330_v50  ;;  %v715_v50 = vand.u32 4294901760, %v655_v45 }
  0x3a   :  { %2770 = vmatpush1.bf16.msra.mxu0 %v3278_v21  ;;  %449 = vmatprep.mubr.f32.mxu0 %v4209_v0 }
  0x3b   :  { %2772 = vmatprep.subr.bf16.mxu0 %v3282_v23 }
  0x3e   :  { %2774 = vmatpush1.bf16.msra.mxu0 %v3300_v34 }
  0x3f   :  { %392 = vmatprep.subr.mxu0 %v3294_v30 }
  0x42   :  { %394 = vmatpush1.msra.mxu0 %v3306_v37 }
  0x43   :  { %2776 = vmatprep.subr.bf16.mxu0 %v2775_v49  ;;  %453 = vmatmul.mubr.f32.vlgmr.msra.gmra.mrb[0].mxu0 %v4302_v13  ;;  %v3491_v49 = vsub.f32 %v669_v25, %v757_v33  ;;  %v676_v13 = vld [vmem:[#allocation2 + $0xf8] sm:$0xff]  ;;  %v3506_v25 = vsub.f32 %v655_v45, %v715_v50 }
  0x44   :  { %2778 = vmatpush1.bf16.msra.mxu0 %v2777_v10  ;;  %553 = vmatprep.mubr.f32.mxu0 %v4209_v0 }
  0x45   :  { %2780 = vmatprep.subr.bf16.mxu0 %v2779_v12  ;;  %4312 = vst [vmem:[#allocation18_spill] sm:$0xff] %v3491_v49  ;;  %v675_v12 = vld [vmem:[#allocation2 + $0xf0] sm:$0xff]  ;;  %4319 = vst [vmem:[#allocation25_spill] sm:$0xff] %v3506_v25 }
  0x48   :  { %2782 = vmatpush1.bf16.msra.mxu0 %v2781_v18 }
  0x49   :  { %494 = vmatprep.subr.mxu0 %v4305_v22 }
  0x4c   :  { %498 = vmatpush1.msra.mxu0 %v4306_v24  ;;  %v659_v24 = vld [vmem:[#allocation2 + $0x70] sm:$0xff] }
  0x4d   :  { %2784 = vmatprep.subr.bf16.mxu0 %v3264_v15  ;;  %555 = vmatmul.mubr.f32.vlgmr.msra.gmra.mrb[0].mxu0 %v3319_v43  ;;  %v760_v15 = vand.u32 4294901760, %v670_v32 }
  0x4e   :  { %2786 = vmatpush1.bf16.msra.mxu0 %v3278_v21  ;;  %635 = vmatprep.mubr.f32.mxu0 %v4209_v0  ;;  %v712_v21 = vand.u32 4294901760, %v654_v36  ;;  %v660_v0 = vld [vmem:[#allocation2 + $0x78] sm:$0xff] }
  0x4f   :  { %2788 = vmatprep.subr.bf16.mxu0 %v3282_v23  ;;  %v3477_v42 = vpack.c.bf16 %v760_v15, %v757_v33  ;;  %v671_v23 = vld [vmem:[#allocation2 + $0xd0] sm:$0xff]  ;;  %v3493_v10 = vsub.f32 %v670_v32, %v760_v15  ;;  %v3510_v33 = vsub.f32 %v673_v20, %v769_v40  ;;  %v3512_v15 = vsub.f32 %v674_v26, %v772_v46 }
  0x50   :  { %v3479_v44 = vpack.c.bf16 %v712_v21, %v709_v41  ;;  %v3499_v17 = vsub.f32 %v654_v36, %v712_v21  ;;  %v3517_v36 = vsub.f32 %v658_v51, %v724_v56  ;;  %v775_v41 = vand.u32 4294901760, %v675_v12 }
  0x51   :  { %4307 = vst [vmem:[#allocation13_spill] sm:$0xff] %v3477_v42  ;;  %2808 = vmatprep.subr.bf16.mxu1 %v3477_v42  ;;  %4313 = vst [vmem:[#allocation19_spill] sm:$0xff] %v3493_v10  ;;  %v778_v21 = vand.u32 4294901760, %v676_v13  ;;  %v4217_v56 = vand.u32 4294901760, %v3385_v8  ;;  %v4257_v42 = vand.u32 4294901760, %v3515_v35 }
  0x52   :  { %2790 = vmatpush1.bf16.msra.mxu0 %v3300_v34  ;;  %4308 = vst [vmem:[#allocation14_spill] sm:$0xff] %v3479_v44  ;;  %v672_v34 = vld [vmem:[#allocation2 + $0xd8] sm:$0xff]  ;;  %2810 = vmatpush3.bf16.msra.mxu1 %v3479_v44  ;;  %4316 = vst [vmem:[#allocation22_spill] sm:$0xff] %v3499_v17 }
  0x53   :  { %578 = vmatprep.subr.mxu0 %v3294_v30  ;;  %v763_v30 = vand.u32 4294901760, %v671_v23  ;;  %4321 = vst [vmem:[#allocation27_spill] sm:$0xff] %v3510_v33  ;;  %4322 = vst [vmem:[#allocation28_spill] sm:$0xff] %v3512_v15  ;;  %v3521_v45 = vpack.c.bf16 %v778_v21, %v775_v41 }
  0x54   :  { %4324 = vst [vmem:[#allocation30_spill] sm:$0xff] %v3517_v36 }
  0x55   :  { %v3501_v18 = vsub.f32 %v671_v23, %v763_v30  ;;  %v727_v23 = vand.u32 4294901760, %v659_v24  ;;  %4325 = vst [vmem:[#allocation31_spill] sm:$0xff] %v3521_v45 }
  0x56   :  { %580 = vmatpush1.msra.mxu0 %v3306_v37  ;;  %v766_v37 = vand.u32 4294901760, %v672_v34 }
  0x57   :  { %637 = vmatmul.mubr.f32.vlgmr.msra.gmra.mrb[0].mxu0 %v3319_v43  ;;  %v656_v43 = vld [vmem:[#allocation2 + $0x58] sm:$0xff]  ;;  %4317 = vst [vmem:[#allocation23_spill] sm:$0xff] %v3501_v18  ;;  %v3530_v26 = vsub.f32 %v659_v24, %v727_v23  ;;  %v4224_v24 = vand.u32 4294901760, %v3398_v28 }
  0x58   :  { %v718_v1 = vand.u32 4294901760, %v656_v43  ;;  %v3483_v38 = vpack.c.bf16 %v766_v37, %v763_v30  ;;  %v3503_v22 = vsub.f32 %v672_v34, %v766_v37  ;;  %v730_v34 = vand.u32 4294901760, %v660_v0 }
  0x59   :  { %v4214_v30 = vand.u32 4294901760, %v3371_v48  ;;  %v4212_v37 = vand.u32 4294901760, %v3375_v61  ;;  %4329 = vst [vmem:[#allocation35_spill] sm:$0xff] %v3530_v26  ;;  %v4267_v31 = vand.u32 4294901760, %v3530_v26 }
  0x5a   :  { %4309 = vst [vmem:[#allocation15_spill] sm:$0xff] %v3483_v38  ;;  %v3485_v14 = vpack.c.bf16 %v718_v1, %v715_v50  ;;  %2812 = vmatprep.subr.bf16.mxu1 %v3483_v38  ;;  %4318 = vst [vmem:[#allocation24_spill] sm:$0xff] %v3503_v22  ;;  %v3508_v32 = vsub.f32 %v656_v43, %v718_v1  ;;  %v3523_v43 = vsub.f32 %v675_v12, %v775_v41 }
  0x5b   :  { %v3525_v50 = vsub.f32 %v676_v13, %v778_v21  ;;  %v4211_v1 = vand.u32 4294901760, %v3379_v63  ;;  %v3528_v20 = vpack.c.bf16 %v730_v34, %v727_v23  ;;  %v3532_v40 = vsub.f32 %v660_v0, %v730_v34 }
  0x5c   :  { %4310 = vst [vmem:[#allocation16_spill] sm:$0xff] %v3485_v14  ;;  %2814 = vmatpush3.bf16.msra.mxu1 %v3485_v14  ;;  %4320 = vst [vmem:[#allocation26_spill] sm:$0xff] %v3508_v32  ;;  %v912_v46 = vsub.f32 %v3371_v48, %v4214_v30  ;;  %v919_v47 = vsub.f32 %v3375_v61, %v4212_v37  ;;  %v4222_v12 = vand.u32 4294901760, %v3387_v9  ;;  %v4223_v13 = vand.u32 4294901760, %v3390_v19 }
  0x5d   :  { %2816 = vmatprep.subr.bf16.mxu1 %v3489_v55  ;;  %4326 = vst [vmem:[#allocation32_spill] sm:$0xff] %v3523_v43  ;;  %4327 = vst [vmem:[#allocation33_spill] sm:$0xff] %v3525_v50  ;;  %v800_v51 = vsub.f32 %v3379_v63, %v4211_v1  ;;  %v807_v23 = vsub.f32 %v3381_v5, %v4213_v39  ;;  %v926_v34 = vsub.f32 %v3385_v8, %v4217_v56 }
  0x5e   :  { %4328 = vst [vmem:[#allocation34_spill] sm:$0xff] %v3528_v20  ;;  %4330 = vst [vmem:[#allocation36_spill] sm:$0xff] %v3532_v40  ;;  %v913_v0 = vand.u32 4294901760, %v912_v46  ;;  %v920_v41 = vand.u32 4294901760, %v919_v47  ;;  %v933_v46 = vsub.f32 %v3387_v9, %v4222_v12  ;;  %v814_v1 = vsub.f32 %v3390_v19, %v4223_v13 }
  0x5f   :  { %v801_v21 = vand.u32 4294901760, %v800_v51  ;;  %v821_v47 = vsub.f32 %v3398_v28, %v4224_v24  ;;  %v4229_v51 = vand.u32 4294901760, %v3400_v27  ;;  %v808_v39 = vand.u32 4294901760, %v807_v23 }
  0x60   :  { %2818 = vmatpush3.bf16.msra.mxu1 %v3495_v11  ;;  %v2823_v37 = vpack.c.bf16 %v920_v41, %v913_v0  ;;  %v927_v30 = vand.u32 4294901760, %v926_v34  ;;  %v934_v56 = vand.u32 4294901760, %v933_v46  ;;  %v4225_v0 = vand.u32 4294901760, %v3406_v7 }
  0x61   :  { %2820 = vmatprep.subr.bf16.mxu1 %v3521_v45  ;;  %v815_v45 = vand.u32 4294901760, %v814_v1  ;;  %v822_v11 = vand.u32 4294901760, %v821_v47  ;;  %v940_v12 = vsub.f32 %v3400_v27, %v4229_v51  ;;  %v3570_v13 = vpack.c.bf16 %v808_v39, %v801_v21 }
  0x62   :  { %v4227_v41 = vand.u32 4294901760, %v3408_v57  ;;  %v3577_v23 = vpack.c.bf16 %v934_v56, %v927_v30  ;;  %v4228_v46 = vand.u32 4294901760, %v3412_v58  ;;  %v4232_v21 = vand.u32 4294901760, %v3414_v54 }
  0x63   :  { %v3579_v34 = vpack.c.bf16 %v822_v11, %v815_v45  ;;  %v941_v1 = vand.u32 4294901760, %v940_v12  ;;  %v4233_v11 = vand.u32 4294901760, %v3420_v59  ;;  %v4237_v45 = vand.u32 4294901760, %v3425_v3 }
  0x64   :  { %2822 = vmatpush3.bf16.msra.mxu1 %v3528_v20  ;;  %v4226_v20 = vand.u32 4294901760, %v3404_v2  ;;  %v835_v39 = vsub.f32 %v3408_v57, %v4227_v41  ;;  %v954_v30 = vsub.f32 %v3412_v58, %v4228_v46  ;;  %v4236_v51 = vand.u32 4294901760, %v3491_v49 }
  0x65   :  { %2824 = vmatprep.subr.bf16.mxu1 %v2823_v37  ;;  %v828_v37 = vsub.f32 %v3406_v7, %v4225_v0  ;;  %v961_v0 = vsub.f32 %v3414_v54, %v4232_v21  ;;  %v842_v41 = vsub.f32 %v3420_v59, %v4233_v11  ;;  %v849_v46 = vsub.f32 %v3425_v3, %v4237_v45 }
  0x66   :  { %v947_v24 = vsub.f32 %v3404_v2, %v4226_v20  ;;  %v955_v20 = vand.u32 4294901760, %v954_v30  ;;  %v968_v30 = vsub.f32 %v3491_v49, %v4236_v51  ;;  %v4242_v11 = vand.u32 4294901760, %v3499_v17 }
  0x67   :  { %v829_v12 = vand.u32 4294901760, %v828_v37  ;;  %v4241_v37 = vand.u32 4294901760, %v3497_v16  ;;  %v850_v21 = vand.u32 4294901760, %v849_v46  ;;  %v4243_v51 = vand.u32 4294901760, %v3501_v18 }
  0x68   :  { %v948_v47 = vand.u32 4294901760, %v947_v24  ;;  %v836_v24 = vand.u32 4294901760, %v835_v39  ;;  %v843_v39 = vand.u32 4294901760, %v842_v41  ;;  %v969_v41 = vand.u32 4294901760, %v968_v30 }
  0x69   :  { %v863_v46 = vsub.f32 %v3499_v17, %v4242_v11  ;;  %v4249_v38 = vand.u32 4294901760, %v3506_v25 }
  0x6a   :  { %v3594_v56 = vpack.c.bf16 %v948_v47, %v941_v1  ;;  %v3606_v55 = vpack.c.bf16 %v836_v24, %v829_v12  ;;  %v962_v1 = vand.u32 4294901760, %v961_v0  ;;  %v4240_v47 = vand.u32 4294901760, %v3493_v10 }
  0x6b   :  { %v856_v0 = vsub.f32 %v3497_v16, %v4241_v37  ;;  %v3622_v24 = vpack.c.bf16 %v850_v21, %v843_v39  ;;  %v982_v37 = vsub.f32 %v3501_v18, %v4243_v51  ;;  %v4250_v21 = vand.u32 4294901760, %v3508_v32 }
  0x6c   :  { %v3614_v14 = vpack.c.bf16 %v962_v1, %v955_v20  ;;  %v975_v12 = vsub.f32 %v3493_v10, %v4240_v47  ;;  %v4248_v1 = vand.u32 4294901760, %v3503_v22  ;;  %v864_v47 = vand.u32 4294901760, %v863_v46 }
  0x6d   :  { %v857_v20 = vand.u32 4294901760, %v856_v0  ;;  %v983_v11 = vand.u32 4294901760, %v982_v37  ;;  %v877_v46 = vsub.f32 %v3508_v32, %v4250_v21  ;;  %v4251_v51 = vand.u32 4294901760, %v3510_v33 }
  0x6e   :  { %v976_v45 = vand.u32 4294901760, %v975_v12  ;;  %v989_v30 = vsub.f32 %v3503_v22, %v4248_v1  ;;  %v870_v12 = vsub.f32 %v3506_v25, %v4249_v38 }
  0x6f   :  { %v3642_v0 = vpack.c.bf16 %v864_v47, %v857_v20  ;;  %v878_v1 = vand.u32 4294901760, %v877_v46  ;;  %v996_v38 = vsub.f32 %v3510_v33, %v4251_v51  ;;  %v4258_v47 = vand.u32 4294901760, %v3517_v36 }
  0x70   :  { %v3634_v39 = vpack.c.bf16 %v976_v45, %v969_v41  ;;  %v990_v44 = vand.u32 4294901760, %v989_v30  ;;  %v871_v45 = vand.u32 4294901760, %v870_v12  ;;  %v4256_v41 = vand.u32 4294901760, %v3512_v15 }
  0x71   :  { %v884_v30 = vsub.f32 %v3515_v35, %v4257_v42  ;;  %v997_v21 = vand.u32 4294901760, %v996_v38  ;;  %v891_v46 = vsub.f32 %v3517_v36, %v4258_v47  ;;  %v4261_v51 = vand.u32 4294901760, %v3523_v43 }
  0x72   :  { %v3654_v37 = vpack.c.bf16 %v990_v44, %v983_v11  ;;  %v1003_v20 = vsub.f32 %v3512_v15, %v4256_v41  ;;  %v3662_v12 = vpack.c.bf16 %v878_v1, %v871_v45  ;;  %v4266_v11 = vand.u32 4294901760, %v3525_v50 }
  0x73   :  { %v885_v44 = vand.u32 4294901760, %v884_v30  ;;  %v892_v41 = vand.u32 4294901760, %v891_v46  ;;  %v1010_v42 = vsub.f32 %v3523_v43, %v4261_v51  ;;  %v4268_v1 = vand.u32 4294901760, %v3532_v40 }
  0x74   :  { %v1004_v4 = vand.u32 4294901760, %v1003_v20  ;;  %v1017_v45 = vsub.f32 %v3525_v50, %v4266_v11  ;;  %v898_v20 = vsub.f32 %v3530_v26, %v4267_v31  ;;  %v2857_v11 = vpack.c.bf16 %v3381_v5, %v3379_v63 }
  0x75   :  { %v2849_v30 = vpack.c.bf16 %v892_v41, %v885_v44  ;;  %v1011_v47 = vand.u32 4294901760, %v1010_v42  ;;  %v905_v46 = vsub.f32 %v3532_v40, %v4268_v1  ;;  %v2859_v31 = vpack.c.bf16 %v3387_v9, %v3385_v8 }
  0x76   :  { %v3674_v38 = vpack.c.bf16 %v1004_v4, %v997_v21  ;;  %v1018_v29 = vand.u32 4294901760, %v1017_v45  ;;  %v899_v51 = vand.u32 4294901760, %v898_v20  ;;  %v2855_v21 = vpack.c.bf16 %v3375_v61, %v3371_v48 }
  0x77   :  { %v906_v53 = vand.u32 4294901760, %v905_v46  ;;  %v2861_v42 = vpack.c.bf16 %v3398_v28, %v3390_v19  ;;  %v2863_v41 = vpack.c.bf16 %v3404_v2, %v3400_v27  ;;  %v2865_v44 = vpack.c.bf16 %v3408_v57, %v3406_v7 }
  0x78   :  { %v2851_v52 = vpack.c.bf16 %v1018_v29, %v1011_v47  ;;  %v2869_v29 = vpack.c.bf16 %v3425_v3, %v3420_v59  ;;  %v2873_v47 = vpack.c.bf16 %v3499_v17, %v3497_v16  ;;  %v2875_v45 = vpack.c.bf16 %v3503_v22, %v3501_v18  ;;  %v51_v22 = vld [vmem:[%s4197_s2] sm:$0x3] }
  0x79   :  { %v2853_v4 = vpack.c.bf16 %v906_v53, %v899_v51  ;;  %v2867_v53 = vpack.c.bf16 %v3414_v54, %v3412_v58  ;;  %v2871_v51 = vpack.c.bf16 %v3493_v10, %v3491_v49  ;;  %v2877_v20 = vpack.c.bf16 %v3508_v32, %v3506_v25 }
  0x7a   :  { %v2879_v46 = vpack.c.bf16 %v3512_v15, %v3510_v33  ;;  %v2881_v1 = vpack.c.bf16 %v3517_v36, %v3515_v35  ;;  %v2883_v3 = vpack.c.bf16 %v3525_v50, %v3523_v43  ;;  %v2885_v10 = vpack.c.bf16 %v3532_v40, %v3530_v26 }
  0x7b   :  { %v53_v49 = vlaneseq }
  0x7d   :  { %v54_v17 = vshrl.u32 %v53_v49, 7 }
  0x7f   :  { %v55_v16 = vsub.s32 0, %v54_v17  ;;  %v59_v32 = vsub.s32 1, %v54_v17 }
  0x81   :  { %v56_v25 = vrot.slane %v51_v22, %v55_v16  ;;  %v60_v18 = vrot.slane %v51_v22, %v59_v32  ;;  %v4339_v32 = vld [vmem:[#allocation16_spill] sm:$0xff] }
 0x12a   :  { %v638_v15 = vpop.f32.mrb[0].mxu0 }
 0x12b   :  { %v3127_v33 = vadd.f32 %v638_v15, %v56_v25  ;;  %v640_v59 = vpop.f32.mrb[1].mxu0  ;;  %v4338_v25 = vld [vmem:[#allocation15_spill] sm:$0xff]  ;;  %v4341_v15 = vld [vmem:[#allocation20_spill] sm:$0xff] }
 0x12c   :  { %v3128_v36 = vadd.f32 %v640_v59, %v60_v18 }
 0x12d   :  { %v643_v35 = vmax.f32 %v3127_v33, 0.0  ;;  %v4340_v33 = vld [vmem:[#allocation17_spill] sm:$0xff] }
 0x12e   :  { %v644_v54 = vmax.f32 %v3128_v36, 0.0  ;;  %v4343_v36 = vand.u32 4294901760, %v3371_v48  ;;  %v4350_v48 = vand.u32 4294901760, %v3390_v19 }
 0x12f   :  { %v3720_v50 = vand.u32 4294901760, %v643_v35 }
 0x130   :  { %v3722_v43 = vand.u32 4294901760, %v644_v54 }
 0x131   :  { %v3725_v49 = vsub.f32 %v643_v35, %v3720_v50  ;;  %v4342_v35 = vld [vmem:[#allocation31_spill] sm:$0xff] }
 0x132   :  { %v781_v40 = vsub.f32 %v644_v54, %v3722_v43  ;;  %v4332_v54 = vld [vmem:[#allocation6_spill] sm:$0xff] }
 0x133   :  { %v788_v26 = vand.u32 4294901760, %v3725_v49 }
 0x134   :  { %v782_v17 = vand.u32 4294901760, %v781_v40 }
 0x135   :  { %v789_v16 = vsub.f32 %v3725_v49, %v788_v26 }
 0x136   :  { %v783_v22 = vsub.f32 %v781_v40, %v782_v17 }
 0x137   :  { %v790_v18 = vand.u32 4294901760, %v789_v16  ;;  %v4375_v16 = vld [vmem:[#allocation25_spill] sm:$0xff] }
 0x138   :  { %v784_v59 = vand.u32 4294901760, %v783_v22  ;;  %v4376_v22 = vand.u32 4294901760, %v4375_v16 }
 0x13a   :  { %785 = vmatprep.mubr.f32.mxu1 %v784_v59  ;;  %v4377_v59 = vld [vmem:[#allocation26_spill] sm:$0xff] }
 0x13b   :  { %791 = vmatmul.mubr.f32.vlgmr.msra.gmra.mrb[0].mxu1 %v790_v18  ;;  %v4378_v18 = vand.u32 4294901760, %v4377_v59 }
 0x13c   :  { %2826 = vmatpush3.bf16.msra.mxu1 %v3570_v13  ;;  %1021 = vmatprep.mubr.f32.mxu1 %v3722_v43 }
 0x13d   :  { %2828 = vmatprep.subr.bf16.mxu1 %v3577_v23  ;;  %v4345_v23 = vld [vmem:[#allocation34_spill] sm:$0xff] }
 0x140   :  { %2830 = vmatpush3.bf16.msra.mxu1 %v3579_v34  ;;  %v4346_v34 = vand.u32 4294901760, %v3379_v63 }
 0x141   :  { %2832 = vmatprep.subr.bf16.mxu1 %v3594_v56  ;;  %v4347_v56 = vand.u32 4294901760, %v3381_v5  ;;  %v4352_v5 = vand.u32 4294901760, %v3400_v27 }
 0x144   :  { %2834 = vmatpush3.bf16.msra.mxu1 %v3606_v55  ;;  %v4335_v55 = vld [vmem:[#allocation12_spill] sm:$0xff] }
 0x145   :  { %2836 = vmatprep.subr.bf16.mxu1 %v3614_v14  ;;  %v4334_v14 = vld [vmem:[#allocation11_spill] sm:$0xff] }
 0x148   :  { %2838 = vmatpush3.bf16.msra.mxu1 %v3622_v24  ;;  %v2921_v24 = vpack.c.bf16 %v4347_v56, %v4346_v34  ;;  %v4381_v34 = vld [vmem:[#allocation28_spill] sm:$0xff] }
 0x149   :  { %2840 = vmatprep.subr.bf16.mxu1 %v3634_v39  ;;  %v4348_v39 = vand.u32 4294901760, %v3385_v8  ;;  %v4382_v56 = vand.u32 4294901760, %v4381_v34 }
 0x14c   :  { %2842 = vmatpush3.bf16.msra.mxu1 %v3642_v0  ;;  %v4349_v0 = vand.u32 4294901760, %v3387_v9  ;;  %v4354_v9 = vand.u32 4294901760, %v3406_v7 }
 0x14d   :  { %2844 = vmatprep.subr.bf16.mxu1 %v3654_v37 }
 0x14e   :  { %v2923_v37 = vpack.c.bf16 %v4349_v0, %v4348_v39  ;;  %v4383_v39 = vld [vmem:[#allocation29_spill] sm:$0xff] }
 0x14f   :  { %v4384_v0 = vand.u32 4294901760, %v4383_v39 }
 0x150   :  { %2846 = vmatpush3.bf16.msra.mxu1 %v3662_v12  ;;  %v4353_v12 = vand.u32 4294901760, %v3404_v2  ;;  %v4363_v2 = vld [vmem:[#allocation18_spill] sm:$0xff] }
 0x151   :  { %2848 = vmatprep.subr.bf16.mxu1 %v3674_v38  ;;  %v4357_v38 = vld [vmem:[#allocation7_spill] sm:$0xff] }
 0x152   :  { %v2927_v8 = vpack.c.bf16 %v4353_v12, %v4352_v5  ;;  %v4358_v19 = vand.u32 4294901760, %v4357_v38  ;;  %v4389_v12 = vld [vmem:[#allocation33_spill] sm:$0xff] }
 0x154   :  { %2850 = vmatpush3.bf16.msra.mxu1 %v2849_v30 }
 0x155   :  { %2852 = vmatprep.subr.bf16.mxu1 %v2851_v52  ;;  %v4331_v52 = vld [vmem:[#allocation5_spill] sm:$0xff] }
 0x158   :  { %2854 = vmatpush3.bf16.msra.mxu1 %v2853_v4 }
 0x159   :  { %2856 = vmatprep.subr.bf16.mxu1 %v2855_v21  ;;  %v4361_v21 = vld [vmem:[#allocation10_spill] sm:$0xff] }
 0x15a   :  { %v4362_v27 = vand.u32 4294901760, %v4361_v21 }
 0x15b   :  { %1023 = vmatmul.mubr.f32.vlgmr.msra.gmra.mrb[2].mxu1 %v3720_v50 }
 0x15c   :  { %2858 = vmatpush3.bf16.msra.mxu1 %v2857_v11  ;;  %1158 = vmatprep.mubr.f32.mxu1 %v781_v40  ;;  %v4344_v40 = vand.u32 4294901760, %v3375_v61  ;;  %v4351_v61 = vand.u32 4294901760, %v3398_v28  ;;  %v4355_v11 = vand.u32 4294901760, %v3408_v57  ;;  %v4359_v28 = vld [vmem:[#allocation8_spill] sm:$0xff]  ;;  %v4367_v57 = vld [vmem:[#allocation21_spill] sm:$0xff] }
 0x15d   :  { %2860 = vmatprep.subr.bf16.mxu1 %v2859_v31  ;;  %v4333_v31 = vld [vmem:[#allocation9_spill] sm:$0xff]  ;;  %v4360_v4 = vand.u32 4294901760, %v4359_v28  ;;  %v3884_v28 = vld [vmem:[%s4200_s5 + $0x30] sm:$0xff] }
 0x15e   :  { %v2919_v13 = vpack.c.bf16 %v4344_v40, %v4343_v36  ;;  %v2925_v63 = vpack.c.bf16 %v4351_v61, %v4350_v48  ;;  %v2941_v36 = vpack.c.bf16 %v4378_v18, %v4376_v22  ;;  %v4379_v40 = vld [vmem:[#allocation27_spill] sm:$0xff] }
 0x160   :  { %2862 = vmatpush3.bf16.msra.mxu1 %v2861_v42  ;;  %v2933_v42 = vpack.c.bf16 %v4362_v27, %v4360_v4  ;;  %v3185_v4 = vmov 0.0|0.0  }
 0x161   :  { %2864 = vmatprep.subr.bf16.mxu1 %v2863_v41  ;;  %v4364_v41 = vand.u32 4294901760, %v4363_v2  ;;  %3007 = vmatprep.subr.bf16.mxu0 %v3185_v4 }
 0x164   :  { %2866 = vmatpush3.bf16.msra.mxu1 %v2865_v44  ;;  %v4365_v44 = vld [vmem:[#allocation19_spill] sm:$0xff] }
 0x165   :  { %2868 = vmatprep.subr.bf16.mxu1 %v2867_v53  ;;  %v4366_v7 = vand.u32 4294901760, %v4365_v44 }
 0x167   :  { %v2935_v53 = vpack.c.bf16 %v4366_v7, %v4364_v41  ;;  %v1554_v41 = vld [vmem:[%s4200_s5 + $0x38] sm:$0xff] }
 0x168   :  { %2870 = vmatpush3.bf16.msra.mxu1 %v2869_v29  ;;  %v4368_v29 = vand.u32 4294901760, %v4367_v57  ;;  %v1589_v57 = vand.u32 4294901760, %v3884_v28 }
 0x169   :  { %2872 = vmatprep.subr.bf16.mxu1 %v2871_v51  ;;  %v4369_v51 = vld [vmem:[#allocation22_spill] sm:$0xff] }
 0x16c   :  { %2874 = vmatpush3.bf16.msra.mxu1 %v2873_v47 }
 0x16d   :  { %2876 = vmatprep.subr.bf16.mxu1 %v2875_v45  ;;  %v4371_v45 = vld [vmem:[#allocation23_spill] sm:$0xff] }
 0x170   :  { %2878 = vmatpush3.bf16.msra.mxu1 %v2877_v20  ;;  %v4372_v20 = vand.u32 4294901760, %v4371_v45  ;;  %v3907_v45 = vld [vmem:[%s4200_s5 + $0x40] sm:$0xff] }
 0x171   :  { %2880 = vmatprep.subr.bf16.mxu1 %v2879_v46  ;;  %v4373_v46 = vld [vmem:[#allocation24_spill] sm:$0xff]  ;;  %v1595_v34 = vand.u32 4294901760, %v3907_v45 }
 0x174   :  { %2882 = vmatpush3.bf16.msra.mxu1 %v2881_v1  ;;  %v4356_v1 = vand.u32 4294901760, %v3412_v58  ;;  %v4370_v58 = vand.u32 4294901760, %v4369_v51 }
 0x175   :  { %2884 = vmatprep.subr.bf16.mxu1 %v2883_v3  ;;  %v4336_v3 = vld [vmem:[#allocation13_spill] sm:$0xff] }
 0x176   :  { %v2931_v30 = vpack.c.bf16 %v4358_v19, %v4356_v1  ;;  %v2937_v47 = vpack.c.bf16 %v4370_v58, %v4368_v29  ;;  %v4393_v1 = vld [vmem:[#allocation36_spill] sm:$0xff] }
 0x177   :  { %v4394_v38 = vand.u32 4294901760, %v4393_v1 }
 0x178   :  { %2886 = vmatpush3.bf16.msra.mxu1 %v2885_v10  ;;  %v4337_v10 = vld [vmem:[#allocation14_spill] sm:$0xff] }
 0x179   :  { %2888 = vmatprep.subr.bf16.mxu1 %v3373_v60 }
 0x17b   :  { %1161 = vmatmul.mubr.f32.vlgmr.msra.gmra.mrb[4].mxu1 %v3725_v49  ;;  %v4374_v49 = vand.u32 4294901760, %v4373_v46 }
 0x17c   :  { %2890 = vmatpush3.bf16.msra.mxu1 %v3377_v62  ;;  %1265 = vmatprep.mubr.f32.mxu1 %v782_v17 }
 0x17d   :  { %2892 = vmatprep.subr.bf16.mxu1 %v3383_v6  ;;  %v2939_v17 = vpack.c.bf16 %v4374_v49, %v4372_v20  ;;  %v3912_v20 = vld [vmem:[%s4200_s5 + $0x48] sm:$0xff]  ;;  %v1592_v49 = vand.u32 4294901760, %v1554_v41 }
 0x180   :  { %2894 = vmatpush3.bf16.msra.mxu1 %v4331_v52 }
 0x181   :  { %2896 = vmatprep.subr.bf16.mxu1 %v4332_v54 }
 0x184   :  { %2898 = vmatpush3.bf16.msra.mxu1 %v4333_v31 }
 0x185   :  { %2900 = vmatprep.subr.bf16.mxu1 %v4334_v14 }
 0x188   :  { %2902 = vmatpush3.bf16.msra.mxu1 %v4335_v55 }
 0x189   :  { %2904 = vmatprep.subr.bf16.mxu1 %v4336_v3 }
 0x18c   :  { %2906 = vmatpush3.bf16.msra.mxu1 %v4337_v10 }
 0x18d   :  { %2908 = vmatprep.subr.bf16.mxu1 %v4338_v25 }
 0x190   :  { %2910 = vmatpush3.bf16.msra.mxu1 %v4339_v32 }
 0x191   :  { %2912 = vmatprep.subr.bf16.mxu1 %v4340_v33 }
 0x194   :  { %2914 = vmatpush3.bf16.msra.mxu1 %v4341_v15 }
 0x195   :  { %2916 = vmatprep.subr.bf16.mxu1 %v4342_v35 }
 0x198   :  { %2918 = vmatpush3.bf16.msra.mxu1 %v4345_v23 }
 0x199   :  { %2920 = vmatprep.subr.bf16.mxu1 %v2919_v13  ;;  %v4380_v13 = vand.u32 4294901760, %v4379_v40 }
 0x19b   :  { %1269 = vmatmul.mubr.f32.vlgmr.msra.gmra.mrb[6].mxu1 %v788_v26  ;;  %v2929_v26 = vpack.c.bf16 %v4355_v11, %v4354_v9  ;;  %v4391_v11 = vld [vmem:[#allocation35_spill] sm:$0xff] }
 0x19c   :  { %2922 = vmatpush3.bf16.msra.mxu1 %v2921_v24  ;;  %1435 = vmatprep.mubr.f32.mxu1 %v3722_v43  ;;  %v2943_v24 = vpack.c.bf16 %v4382_v56, %v4380_v13  ;;  %v3930_v13 = vsub.f32 %v1554_v41, %v1592_v49  ;;  %v1598_v56 = vand.u32 4294901760, %v3912_v20 }
 0x19d   :  { %2924 = vmatprep.subr.bf16.mxu1 %v2923_v37  ;;  %v4385_v37 = vld [vmem:[#allocation30_spill] sm:$0xff] }
 0x19e   :  { %v4386_v48 = vand.u32 4294901760, %v4385_v37 }
 0x1a0   :  { %2926 = vmatpush3.bf16.msra.mxu1 %v2925_v63  ;;  %v2945_v61 = vpack.c.bf16 %v4386_v48, %v4384_v0  ;;  %v4387_v63 = vld [vmem:[#allocation32_spill] sm:$0xff] }
 0x1a1   :  { %2928 = vmatprep.subr.bf16.mxu1 %v2927_v8  ;;  %v4388_v5 = vand.u32 4294901760, %v4387_v63  ;;  %v4390_v8 = vand.u32 4294901760, %v4389_v12  ;;  %v3949_v63 = vsub.f32 %v3907_v45, %v1595_v34  ;;  %v3959_v12 = vld [vmem:[%s4200_s5 + $0x50] sm:$0xff] }
 0x1a3   :  { %v2947_v9 = vpack.c.bf16 %v4390_v8, %v4388_v5  ;;  %v3954_v5 = vsub.f32 %v3912_v20, %v1598_v56  ;;  %v3964_v8 = vld [vmem:[%s4200_s5 + $0x58] sm:$0xff]  ;;  %v4395_v20 = vmov 0.0  }
 0x1a4   :  { %2930 = vmatpush3.bf16.msra.mxu1 %v2929_v26  ;;  %v4392_v26 = vand.u32 4294901760, %v4391_v11  ;;  %2600 = vmatprep.mubr.msk.f32.mxu0 %vm3186_vm2, %v4395_v20 }
 0x1a5   :  { %2932 = vmatprep.subr.bf16.mxu1 %v2931_v30  ;;  %v1552_v30 = vld [vmem:[%s4200_s5 + $0x28] sm:$0xff] }
 0x1a6   :  { %v2949_v19 = vpack.c.bf16 %v4394_v38, %v4392_v26  ;;  %v1586_v2 = vand.u32 4294901760, %v1552_v30 }
 0x1a8   :  { %2934 = vmatpush3.bf16.msra.mxu1 %v2933_v42 }
 0x1a9   :  { %2936 = vmatprep.subr.bf16.mxu1 %v2935_v53 }
 0x1ac   :  { %2938 = vmatpush3.bf16.msra.mxu1 %v2937_v47  ;;  %v3902_v47 = vsub.f32 %v1552_v30, %v1586_v2 }
 0x1ad   :  { %2940 = vmatprep.subr.bf16.mxu1 %v2939_v17  ;;  %v3916_v17 = vsub.f32 %v3884_v28, %v1589_v57 }
 0x1af   :  { %v1706_v40 = vand.u32 4294901760, %v3916_v17 }
 0x1b0   :  { %2942 = vmatpush3.bf16.msra.mxu1 %v2941_v36  ;;  %v1699_v36 = vand.u32 4294901760, %v3902_v47 }
 0x1b1   :  { %2944 = vmatprep.subr.bf16.mxu1 %v2943_v24  ;;  %v1707_v48 = vsub.f32 %v3916_v17, %v1706_v40 }
 0x1b2   :  { %v1700_v37 = vsub.f32 %v3902_v47, %v1699_v36 }
 0x1b3   :  { %v1708_v38 = vand.u32 4294901760, %v1707_v48 }
 0x1b4   :  { %2946 = vmatpush3.bf16.msra.mxu1 %v2945_v61  ;;  %v1713_v61 = vand.u32 4294901760, %v3930_v13  ;;  %v1701_v26 = vand.u32 4294901760, %v1700_v37  ;;  %v1562_v37 = vld [vmem:[%s4200_s5 + $0x78] sm:$0xff] }
 0x1b5   :  { %2948 = vmatprep.subr.bf16.mxu1 %v2947_v9 }
 0x1b8   :  { %2950 = vmatpush3.bf16.msra.mxu1 %v2949_v19  ;;  %v1714_v19 = vsub.f32 %v3930_v13, %v1713_v61 }
 0x1b9   :  { %2952 = vmatprep.subr.bf16.mxu1 %v3373_v60  ;;  %v1547_v60 = vld [vmem:[%s4200_s5] sm:$0xff] }
 0x1bb   :  { %1437 = vmatmul.mubr.f32.vlgmr.msra.gmra.mrb[8].mxu1 %v3720_v50 }
 0x1bc   :  { %2954 = vmatpush3.bf16.msra.mxu1 %v3377_v62  ;;  %1539 = vmatprep.mubr.f32.mxu1 %v3722_v43  ;;  %v1548_v62 = vld [vmem:[%s4200_s5 + $0x8] sm:$0xff] }
 0x1bd   :  { %2956 = vmatprep.subr.bf16.mxu1 %v3383_v6  ;;  %v1571_v6 = vand.u32 4294901760, %v1547_v60  ;;  %v1574_v43 = vand.u32 4294901760, %v1548_v62 }
 0x1bf   :  { %v3895_v53 = vpack.c.bf16 %v1574_v43, %v1571_v6 }
 0x1c0   :  { %2958 = vmatpush3.bf16.msra.mxu1 %v4331_v52 }
 0x1c1   :  { %2960 = vmatprep.subr.bf16.mxu1 %v4332_v54  ;;  %v3855_v54 = vsub.f32 %v1547_v60, %v1571_v6  ;;  %v1720_v60 = vand.u32 4294901760, %v3949_v63 }
 0x1c4   :  { %2962 = vmatpush3.bf16.msra.mxu1 %v4333_v31  ;;  %v3857_v31 = vsub.f32 %v1548_v62, %v1574_v43  ;;  %v1727_v62 = vand.u32 4294901760, %v3954_v5  ;;  %v1601_v43 = vand.u32 4294901760, %v3959_v12 }
 0x1c5   :  { %2964 = vmatprep.subr.bf16.mxu1 %v4334_v14 }
 0x1c8   :  { %2966 = vmatpush3.bf16.msra.mxu1 %v4335_v55  ;;  %v1550_v55 = vld [vmem:[%s4200_s5 + $0x18] sm:$0xff] }
 0x1c9   :  { %2968 = vmatprep.subr.bf16.mxu1 %v4336_v3 }
 0x1cc   :  { %2970 = vmatpush3.bf16.msra.mxu1 %v4337_v10  ;;  %v1664_v10 = vand.u32 4294901760, %v3855_v54 }
 0x1cd   :  { %2972 = vmatprep.subr.bf16.mxu1 %v4338_v25  ;;  %v1671_v25 = vand.u32 4294901760, %v3857_v31 }
 0x1d0   :  { %2974 = vmatpush3.bf16.msra.mxu1 %v4339_v32 }
 0x1d1   :  { %2976 = vmatprep.subr.bf16.mxu1 %v4340_v33  ;;  %v1580_v33 = vand.u32 4294901760, %v1550_v55 }
 0x1d3   :  { %v3889_v27 = vsub.f32 %v1550_v55, %v1580_v33  ;;  %v1728_v55 = vsub.f32 %v3954_v5, %v1727_v62 }
 0x1d4   :  { %2978 = vmatpush3.bf16.msra.mxu1 %v4341_v15  ;;  %v1665_v15 = vsub.f32 %v3855_v54, %v1664_v10 }
 0x1d5   :  { %2980 = vmatprep.subr.bf16.mxu1 %v4342_v35  ;;  %v1672_v35 = vsub.f32 %v3857_v31, %v1671_v25  ;;  %v1685_v51 = vand.u32 4294901760, %v3889_v27  ;;  %v1729_v30 = vand.u32 4294901760, %v1728_v55 }
 0x1d6   :  { %v1666_v44 = vand.u32 4294901760, %v1665_v15 }
 0x1d7   :  { %v1673_v7 = vand.u32 4294901760, %v1672_v35  ;;  %v1686_v59 = vsub.f32 %v3889_v27, %v1685_v51 }
 0x1d8   :  { %2982 = vmatpush3.bf16.msra.mxu1 %v4345_v23  ;;  %v1551_v23 = vld [vmem:[%s4200_s5 + $0x20] sm:$0xff] }
 0x1d9   :  { %2983 = vmatprep.subr.bf16.mxu1 %v3185_v4  ;;  %v1583_v42 = vand.u32 4294901760, %v1551_v23  ;;  %v3008_v46 = vpack.c.bf16 %v1673_v7, %v1666_v44  ;;  %v1687_v39 = vand.u32 4294901760, %v1686_v59  ;;  %v1559_v44 = vld [vmem:[%s4200_s5 + $0x60] sm:$0xff]  ;;  %v1560_v7 = vld [vmem:[%s4200_s5 + $0x68] sm:$0xff] }
 0x1db   :  { %1541 = vmatmul.mubr.f32.vlgmr.msra.gmra.mrb[10].mxu1 %v3720_v50  ;;  %v1549_v50 = vld [vmem:[%s4200_s5 + $0x10] sm:$0xff]  ;;  %v3900_v58 = vsub.f32 %v1551_v23, %v1583_v42  ;;  %3009 = vmatpush3.bf16.msra.mxu0 %v3008_v46  ;;  %v3967_v1 = vpack.c.bf16 %v1586_v2, %v1583_v42  ;;  %v1610_v46 = vand.u32 4294901760, %v1560_v7 }
 0x1dc   :  { %v1577_v32 = vand.u32 4294901760, %v1549_v50  ;;  %2985 = vmatpush3.bf16.msra.mxu1 %v3895_v53  ;;  %3010 = vmatprep.subr.bf16.mxu0 %v3185_v4 }
 0x1dd   :  { %v1692_v18 = vand.u32 4294901760, %v3900_v58  ;;  %2986 = vmatprep.subr.bf16.mxu1 %v3185_v4  ;;  %2565 = vmatprep.mubr.msk.f32.mxu1 %vm3186_vm2, %v4395_v20 }
 0x1de   :  { %v3887_v21 = vsub.f32 %v1549_v50, %v1577_v32  ;;  %v3918_v16 = vpack.c.bf16 %v1580_v33, %v1577_v32  ;;  %v1721_v50 = vsub.f32 %v3949_v63, %v1720_v60  ;;  %v3984_v32 = vpack.c.bf16 %v1592_v49, %v1589_v57 }
 0x1df   :  { %v1693_v0 = vsub.f32 %v3900_v58, %v1692_v18  ;;  %v3990_v33 = vsub.f32 %v3959_v12, %v1601_v43  ;;  %v1607_v57 = vand.u32 4294901760, %v1559_v44 }
 0x1e0   :  { %v1678_v29 = vand.u32 4294901760, %v3887_v21  ;;  %2988 = vmatpush3.bf16.msra.mxu1 %v3918_v16  ;;  %v1722_v23 = vand.u32 4294901760, %v1721_v50 }
 0x1e1   :  { %v1694_v11 = vand.u32 4294901760, %v1693_v0  ;;  %2989 = vmatprep.subr.bf16.mxu1 %v3185_v4  ;;  %v1734_v28 = vand.u32 4294901760, %v3990_v33  ;;  %v1561_v0 = vld [vmem:[%s4200_s5 + $0x70] sm:$0xff] }
 0x1e2   :  { %v1679_v22 = vsub.f32 %v3887_v21, %v1678_v29  ;;  %v3020_v49 = vpack.c.bf16 %v1729_v30, %v1722_v23 }
 0x1e3   :  { %v3014_v6 = vpack.c.bf16 %v1701_v26, %v1694_v11  ;;  %v1735_v2 = vsub.f32 %v3990_v33, %v1734_v28  ;;  %v1613_v11 = vand.u32 4294901760, %v1561_v0  ;;  %v1616_v26 = vand.u32 4294901760, %v1562_v37 }
 0x1e4   :  { %v1680_v24 = vand.u32 4294901760, %v1679_v22  ;;  %2991 = vmatpush3.bf16.msra.mxu1 %v3967_v1 }
 0x1e5   :  { %2992 = vmatprep.subr.bf16.mxu1 %v3185_v4  ;;  %v1736_v22 = vand.u32 4294901760, %v1735_v2  ;;  %v4036_v50 = vsub.f32 %v1562_v37, %v1616_v26  ;;  %v2219_v2 = vld [vmem:[%s4199_s4] ss:$0 sm:$0xff]  ;;  %v4081_v12 = vpack.c.bf16 %v1616_v26, %v1613_v11 }
 0x1e6   :  { %v3011_v9 = vpack.c.bf16 %v1687_v39, %v1680_v24  ;;  %v4015_v24 = vsub.f32 %v1559_v44, %v1607_v57  ;;  %v4017_v39 = vsub.f32 %v1560_v7, %v1610_v46 }
 0x1e7   :  { %v4288_v30 = vand.u32 4294901760, %v4036_v50 }
 0x1e8   :  { %3012 = vmatpush3.bf16.msra.mxu0 %v3011_v9  ;;  %2994 = vmatpush3.bf16.msra.mxu1 %v3984_v32  ;;  %v4291_v48 = vand.u32 4294901760, %v4015_v24  ;;  %v4290_v9 = vand.u32 4294901760, %v4017_v39 }
 0x1e9   :  { %3013 = vmatprep.subr.bf16.mxu0 %v3185_v4  ;;  %2995 = vmatprep.subr.bf16.mxu1 %v3185_v4 }
 0x1ec   :  { %3015 = vmatpush3.bf16.msra.mxu0 %v3014_v6  ;;  %v1756_v6 = vsub.f32 %v4017_v39, %v4290_v9 }
 0x1ed   :  { %3016 = vmatprep.subr.bf16.mxu0 %v3185_v4 }
 0x20e   :  { %v2253_v52 = vpop.f32.mrb[0].mxu1 }
 0x20f   :  { %v2254_v14 = vpop.f32.mrb[1].mxu1 }
 0x210   :  { %v3865_v3 = vadd.f32 %v2254_v14, %v2253_v52  ;;  %v1604_v52 = vand.u32 4294901760, %v3964_v8  ;;  %v1715_v14 = vand.u32 4294901760, %v1714_v19  ;;  %v1749_v19 = vsub.f32 %v4015_v24, %v4291_v48 }
 0x212   :  { %v3995_v15 = vsub.f32 %v3964_v8, %v1604_v52  ;;  %v3017_v35 = vpack.c.bf16 %v1715_v14, %v1708_v38  ;;  %v4034_v14 = vsub.f32 %v1561_v0, %v1613_v11  ;;  %v1750_v55 = vand.u32 4294901760, %v1749_v19 }
 0x213   :  { %v793_v0 = vadd.f32 %v3865_v3, %v2219_v2  ;;  %v4064_v45 = vpack.c.bf16 %v1604_v52, %v1601_v43  ;;  %v3032_v3 = vpack.c.bf16 %v3857_v31, %v3855_v54  ;;  %v3038_v8 = vpack.c.bf16 %v3902_v47, %v3900_v58 }
 0x214   :  { %v4292_v42 = vand.u32 4294901760, %v3995_v15  ;;  %3018 = vmatpush3.bf16.msra.mxu0 %v3017_v35  ;;  %v1757_v35 = vand.u32 4294901760, %v1756_v6  ;;  %v4289_v23 = vand.u32 4294901760, %v4034_v14  ;;  %v3041_v43 = vpack.c.bf16 %v3930_v13, %v3916_v17 }
 0x215   :  { %3019 = vmatprep.subr.bf16.mxu0 %v3185_v4  ;;  %v3044_v52 = vpack.c.bf16 %v3954_v5, %v3949_v63  ;;  %v3086_v54 = vpack.c.bf16 %v1699_v36, %v1692_v18  ;;  %v3089_v31 = vpack.c.bf16 %v1713_v61, %v1706_v40  ;;  %v4399_v58 = vand.u32 4294901760, %v4034_v14  ;;  %v2220_v18 = vld [vmem:[%s4201_s6] ss:$0 sm:$0xff] }
 0x216   :  { %v1742_v41 = vsub.f32 %v3995_v15, %v4292_v42  ;;  %v3026_v44 = vpack.c.bf16 %v1757_v35, %v1750_v55  ;;  %v1763_v7 = vsub.f32 %v4034_v14, %v4289_v23  ;;  %v3050_v35 = vpack.c.bf16 %v4017_v39, %v4015_v24 }
 0x217   :  { %v4400_v47 = vand.u32 4294901760, %v4036_v50 }
 0x218   :  { %v1743_v59 = vand.u32 4294901760, %v1742_v41  ;;  %3021 = vmatpush3.bf16.msra.mxu0 %v3020_v49  ;;  %v1770_v49 = vsub.f32 %v4036_v50, %v4288_v30 }
 0x219   :  { %3022 = vmatprep.subr.bf16.mxu0 %v3185_v4  ;;  %v3101_v17 = vpack.c.bf16 %v4400_v47, %v4399_v58 }
 0x21a   :  { %v3023_v38 = vpack.c.bf16 %v1743_v59, %v1736_v22  ;;  %v4054_v59 = vpack.c.bf16 %v1598_v56, %v1595_v34  ;;  %v1771_v19 = vand.u32 4294901760, %v1770_v49  ;;  %v4075_v34 = vpack.c.bf16 %v1610_v46, %v1607_v57 }
 0x21b   :  { %v3035_v56 = vpack.c.bf16 %v3889_v27, %v3887_v21  ;;  %v3047_v57 = vpack.c.bf16 %v3995_v15, %v3990_v33  ;;  %v4397_v27 = vand.u32 4294901760, %v4015_v24 }
 0x21c   :  { %3024 = vmatpush3.bf16.msra.mxu0 %v3023_v38  ;;  %v1764_v38 = vand.u32 4294901760, %v1763_v7  ;;  %2997 = vmatpush3.bf16.msra.mxu1 %v4054_v59 }
 0x21d   :  { %3025 = vmatprep.subr.bf16.mxu0 %v3185_v4  ;;  %2998 = vmatprep.subr.bf16.mxu1 %v3185_v4 }
 0x21e   :  { %v3029_v55 = vpack.c.bf16 %v1771_v19, %v1764_v38 }
 0x220   :  { %3027 = vmatpush3.bf16.msra.mxu0 %v3026_v44  ;;  %3000 = vmatpush3.bf16.msra.mxu1 %v4064_v45 }
 0x221   :  { %3028 = vmatprep.subr.bf16.mxu0 %v3185_v4  ;;  %3001 = vmatprep.subr.bf16.mxu1 %v3185_v4 }
 0x224   :  { %3030 = vmatpush3.bf16.msra.mxu0 %v3029_v55  ;;  %3003 = vmatpush3.bf16.msra.mxu1 %v4075_v34 }
 0x225   :  { %3031 = vmatprep.subr.bf16.mxu0 %v3185_v4  ;;  %3004 = vmatprep.subr.bf16.mxu1 %v3185_v4 }
 0x228   :  { %3006 = vmatpush3.bf16.msra.mxu1 %v4081_v12 }
 0x22e   :  { %v2288_v41 = vpop.f32.mrb[2].mxu1 }
 0x22f   :  { %v2289_v22 = vpop.f32.mrb[3].mxu1 }
 0x230   :  { %v2290_v37 = vadd.f32 %v2289_v22, %v2288_v41  ;;  %v3053_v41 = vpack.c.bf16 %v4036_v50, %v4034_v14 }
 0x232   :  { %v1025_v6 = vadd.f32 %v2290_v37, %v793_v0 }
 0x24e   :  { %v2323_v46 = vpop.f32.mrb[4].mxu1 }
 0x24f   :  { %v2324_v11 = vpop.f32.mrb[5].mxu1 }
 0x250   :  { %v2325_v26 = vadd.f32 %v2324_v11, %v2323_v46 }
 0x252   :  { %v1163_v2 = vadd.f32 %v2325_v26, %v1025_v6 }
 0x26e   :  { %v2358_v44 = vpop.f32.mrb[6].mxu1 }
 0x26f   :  { %v2359_v7 = vpop.f32.mrb[7].mxu1 }
 0x270   :  { %v2360_v49 = vadd.f32 %v2359_v7, %v2358_v44 }
 0x272   :  { %v1271_v22 = vadd.f32 %v2360_v49, %v1163_v2 }
 0x28e   :  { %v2393_v0 = vpop.f32.mrb[8].mxu1 }
 0x28f   :  { %v2394_v37 = vpop.f32.mrb[9].mxu1 }
 0x290   :  { %v2395_v38 = vadd.f32 %v2394_v37, %v2393_v0 }
 0x292   :  { %v1439_v19 = vadd.f32 %v2395_v38, %v1271_v22 }
 0x2ae   :  { %v2428_v55 = vpop.f32.mrb[10].mxu1 }
 0x2af   :  { %v2429_v30 = vpop.f32.mrb[11].mxu1 }
 0x2b0   :  { %v2430_v23 = vadd.f32 %v2429_v30, %v2428_v55 }
 0x2b2   :  { %v1543_v9 = vadd.f32 %v2430_v23, %v1439_v19 }
 0x2b4   :  { %v1546_v48 = vmax.f32 %v1543_v9, 0.0  ;;  %v3083_v9 = vpack.c.bf16 %v1685_v51, %v1678_v29  ;;  %v4398_v29 = vand.u32 4294901760, %v4017_v39 }
 0x2b6   :  { %v4096_v42 = vand.u32 4294901760, %v1546_v48  ;;  %v3098_v51 = vpack.c.bf16 %v4398_v29, %v4397_v27 }
 0x2b8   :  { %v1652_v6 = vsub.f32 %v1546_v48, %v4096_v42  ;;  %2601 = vmatmul.mubr.f32.vlgmr.msra.gmra.mrb[2].mxu0 %v4096_v42  ;;  %v3080_v48 = vpack.c.bf16 %v1671_v25, %v1664_v10  ;;  %v3092_v10 = vpack.c.bf16 %v1727_v62, %v1720_v60  ;;  %v4396_v25 = vand.u32 4294901760, %v3995_v15 }
 0x2b9   :  { %3033 = vmatpush3.bf16.msra.mxu0 %v3032_v3  ;;  %2635 = vmatprep.mubr.msk.f32.mxu0 %vm3186_vm2, %v4395_v20 }
 0x2ba   :  { %v1653_v46 = vand.u32 4294901760, %v1652_v6  ;;  %3034 = vmatprep.subr.bf16.mxu0 %v3185_v4  ;;  %v3095_v21 = vpack.c.bf16 %v4396_v25, %v1734_v28 }
 0x2bc   :  { %v1654_v11 = vsub.f32 %v1652_v6, %v1653_v46 }
 0x2bd   :  { %3036 = vmatpush3.bf16.msra.mxu0 %v3035_v56 }
 0x2be   :  { %3037 = vmatprep.subr.bf16.mxu0 %v3185_v4  ;;  %v1655_v30 = vand.u32 4294901760, %v1654_v11 }
 0x2c0   :  { %2566 = vmatmul.mubr.f32.vlgmr.msra.gmra.mrb[12].mxu1 %v1655_v30 }
 0x2c1   :  { %3039 = vmatpush3.bf16.msra.mxu0 %v3038_v8 }
 0x2c2   :  { %3040 = vmatprep.subr.bf16.mxu0 %v3185_v4 }
 0x2c5   :  { %3042 = vmatpush3.bf16.msra.mxu0 %v3041_v43 }
 0x2c6   :  { %3043 = vmatprep.subr.bf16.mxu0 %v3185_v4 }
 0x2c9   :  { %3045 = vmatpush3.bf16.msra.mxu0 %v3044_v52 }
 0x2ca   :  { %3046 = vmatprep.subr.bf16.mxu0 %v3185_v4 }
 0x2cd   :  { %3048 = vmatpush3.bf16.msra.mxu0 %v3047_v57 }
 0x2ce   :  { %3049 = vmatprep.subr.bf16.mxu0 %v3185_v4 }
 0x2d1   :  { %3051 = vmatpush3.bf16.msra.mxu0 %v3050_v35 }
 0x2d2   :  { %3052 = vmatprep.subr.bf16.mxu0 %v3185_v4 }
 0x2d5   :  { %3054 = vmatpush3.bf16.msra.mxu0 %v3053_v41 }
 0x2d6   :  { %3055 = vmatprep.subr.bf16.mxu0 %v3185_v4 }
 0x2d8   :  { %2636 = vmatmul.mubr.f32.vlgmr.msra.gmra.mrb[2].mxu0 %v1652_v6 }
 0x2d9   :  { %3057 = vmatpush3.bf16.msra.mxu0 %v3895_v53  ;;  %2670 = vmatprep.mubr.msk.f32.mxu0 %vm3186_vm2, %v4395_v20 }
 0x2da   :  { %3058 = vmatprep.subr.bf16.mxu0 %v3185_v4 }
 0x2dd   :  { %3060 = vmatpush3.bf16.msra.mxu0 %v3918_v16 }
 0x2de   :  { %3061 = vmatprep.subr.bf16.mxu0 %v3185_v4 }
 0x2e1   :  { %3063 = vmatpush3.bf16.msra.mxu0 %v3967_v1 }
 0x2e2   :  { %3064 = vmatprep.subr.bf16.mxu0 %v3185_v4 }
 0x2e5   :  { %3066 = vmatpush3.bf16.msra.mxu0 %v3984_v32 }
 0x2e6   :  { %3067 = vmatprep.subr.bf16.mxu0 %v3185_v4 }
 0x2e9   :  { %3069 = vmatpush3.bf16.msra.mxu0 %v4054_v59 }
 0x2ea   :  { %3070 = vmatprep.subr.bf16.mxu0 %v3185_v4 }
 0x2ed   :  { %3072 = vmatpush3.bf16.msra.mxu0 %v4064_v45 }
 0x2ee   :  { %3073 = vmatprep.subr.bf16.mxu0 %v3185_v4 }
 0x2f1   :  { %3075 = vmatpush3.bf16.msra.mxu0 %v4075_v34 }
 0x2f2   :  { %3076 = vmatprep.subr.bf16.mxu0 %v3185_v4 }
 0x2f5   :  { %3078 = vmatpush3.bf16.msra.mxu0 %v4081_v12 }
 0x2f6   :  { %3079 = vmatprep.subr.bf16.mxu0 %v3185_v4 }
 0x2f8   :  { %2671 = vmatmul.mubr.f32.vlgmr.msra.gmra.mrb[2].mxu0 %v1653_v46 }
 0x2f9   :  { %3081 = vmatpush3.bf16.msra.mxu0 %v3080_v48  ;;  %2705 = vmatprep.mubr.msk.f32.mxu0 %vm3186_vm2, %v4395_v20 }
 0x2fa   :  { %3082 = vmatprep.subr.bf16.mxu0 %v3185_v4 }
 0x2fd   :  { %3084 = vmatpush3.bf16.msra.mxu0 %v3083_v9 }
 0x2fe   :  { %3085 = vmatprep.subr.bf16.mxu0 %v3185_v4 }
 0x301   :  { %3087 = vmatpush3.bf16.msra.mxu0 %v3086_v54 }
 0x302   :  { %3088 = vmatprep.subr.bf16.mxu0 %v3185_v4 }
 0x305   :  { %3090 = vmatpush3.bf16.msra.mxu0 %v3089_v31 }
 0x306   :  { %3091 = vmatprep.subr.bf16.mxu0 %v3185_v4 }
 0x309   :  { %3093 = vmatpush3.bf16.msra.mxu0 %v3092_v10 }
 0x30a   :  { %3094 = vmatprep.subr.bf16.mxu0 %v3185_v4 }
 0x30d   :  { %3096 = vmatpush3.bf16.msra.mxu0 %v3095_v21 }
 0x30e   :  { %3097 = vmatprep.subr.bf16.mxu0 %v3185_v4 }
 0x311   :  { %3099 = vmatpush3.bf16.msra.mxu0 %v3098_v51 }
 0x312   :  { %3100 = vmatprep.subr.bf16.mxu0 %v3185_v4 }
 0x315   :  { %3102 = vmatpush3.bf16.msra.mxu0 %v3101_v17 }
 0x316   :  { %3103 = vmatprep.subr.bf16.mxu0 %v3185_v4 }
 0x318   :  { %2706 = vmatmul.mubr.f32.vlgmr.msra.gmra.mrb[2].mxu0 %v4096_v42 }
 0x319   :  { %3105 = vmatpush3.bf16.msra.mxu0 %v3895_v53  ;;  %2740 = vmatprep.mubr.msk.f32.mxu0 %vm3186_vm2, %v4395_v20 }
 0x31a   :  { %3106 = vmatprep.subr.bf16.mxu0 %v3185_v4 }
 0x31d   :  { %3108 = vmatpush3.bf16.msra.mxu0 %v3918_v16 }
 0x31e   :  { %3109 = vmatprep.subr.bf16.mxu0 %v3185_v4 }
 0x321   :  { %3111 = vmatpush3.bf16.msra.mxu0 %v3967_v1 }
 0x322   :  { %3112 = vmatprep.subr.bf16.mxu0 %v3185_v4 }
 0x325   :  { %3114 = vmatpush3.bf16.msra.mxu0 %v3984_v32 }
 0x326   :  { %3115 = vmatprep.subr.bf16.mxu0 %v3185_v4 }
 0x329   :  { %3117 = vmatpush3.bf16.msra.mxu0 %v4054_v59 }
 0x32a   :  { %3118 = vmatprep.subr.bf16.mxu0 %v3185_v4 }
 0x32d   :  { %3120 = vmatpush3.bf16.msra.mxu0 %v4064_v45 }
 0x32e   :  { %3121 = vmatprep.subr.bf16.mxu0 %v3185_v4 }
 0x331   :  { %3123 = vmatpush3.bf16.msra.mxu0 %v4075_v34 }
 0x332   :  { %3124 = vmatprep.subr.bf16.mxu0 %v3185_v4 }
 0x335   :  { %3126 = vmatpush3.bf16.msra.mxu0 %v4081_v12 }
 0x338   :  { %2741 = vmatmul.mubr.f32.vlgmr.msra.gmra.mrb[2].mxu0 %v4096_v42 }
 0x393   :  { %v1657_v53 = vpop.f32.mrb[12].mxu1 }
 0x394   :  { %v2567_v16 = vpop.f32.mrb[13].mxu1  ;;  %v1658_v36 = vadd.f32 %v2220_v18, %v1657_v53 }
 0x40b   :  { %v2207_v40 = vpop.f32.mrb[2].mxu0 }
 0x40c   :  { %v3130_v13 = vadd.f32 %v2207_v40, %v1658_v36  ;;  %v2742_v61 = vpop.f32.mrb[3].mxu0 }
 0x40e   :  { %3155 = vtanh.f32 %v3130_v13 }
 0x418   :  { %v3156_v63 = vpop.eup %3155 }
 0x419   :  { %2213 = vst.msk [vmem:[%s4202_s7] sm:$0xff] %vm2212_vm3, %v3156_v63 }
 0x41a   :  { %2218 = vsyncpa [#allocation3], 1 }

</bundles_post_ra>
